<compile_context>
chip_gen: v6e
topology: v6e:2x2x1
jax: 0.10.0
libtpu: 0.0.40
codegen_flags: <defaults>
</compile_context>

<pallas_src>
import math
import functools

import jax
import jax.numpy as jnp
import numpy as np
from jax import lax
from jax.experimental import pallas as pl
from jax.experimental.pallas import tpu as pltpu


def _banded_attention_kernel(*refs, num_heads, head_dim, tq, tk, nb, hw,
                             seq_len, lk):
    n_x = 1 + 2 * nb
    x_q_ref = refs[0]
    kv_x_refs = list(refs[1:1 + nb]) + [x_q_ref] + list(refs[1 + nb:n_x])
    (wq_ref, bq_ref, wk_ref, bk_ref, wv_ref, bv_ref,
     wo_ref, bo_ref, gamma_ref, beta_ref) = refs[n_x:n_x + 10]
    out_ref = refs[n_x + 10]
    xkv_ref = refs[n_x + 11]

    qi = pl.program_id(1)
    d_model = x_q_ref.shape[-1]

    # Stage the in-band KV window once per (batch, query-block) as bf16.
    for i, r in enumerate(kv_x_refs):
        xkv_ref[i * tk:(i + 1) * tk, :] = r[...].astype(jnp.bfloat16)

    # Additive band-mask bias built from iota (the (S, S) mask never exists).
    row = qi * tq + lax.broadcasted_iota(jnp.int32, (tq, lk), 0)
    col = (qi - nb) * tk + lax.broadcasted_iota(jnp.int32, (tq, lk), 1)
    in_band = ((col >= 0) & (col < seq_len) &
               (col >= row - hw) & (col <= row + hw))
    band_bias = jnp.where(in_band, jnp.float32(0.0), jnp.float32(-1e30))

    scale = jnp.float32(1.0 / math.sqrt(head_dim))
    xq_b = xkv_ref[nb * tk:nb * tk + tq, :]        # (TQ, D) bf16 query rows
    xkv_b = xkv_ref[...]                           # (LK, D) bf16 KV window

    def head_body(h, acc):
        # Per-head projections: leading-axis indexing of the head-split
        # weights (no lane-dim slicing); bf16 MXU with f32 accumulation.
        q = (jnp.dot(xq_b, wq_ref[h], preferred_element_type=jnp.float32)
             + bq_ref[h]) * scale                                  # (TQ, hd)
        k = (jnp.dot(xkv_b, wk_ref[h], preferred_element_type=jnp.float32)
             + bk_ref[h])                                          # (LK, hd)
        v = (jnp.dot(xkv_b, wv_ref[h], preferred_element_type=jnp.float32)
             + bv_ref[h])                                          # (LK, hd)

        # Scores over the in-band KV window only.
        s = lax.dot_general(q.astype(jnp.bfloat16), k.astype(jnp.bfloat16),
                            (((1,), (1,)), ((), ())),
                            preferred_element_type=jnp.float32)    # (TQ, LK)
        s = s + band_bias
        m = jnp.max(s, axis=-1, keepdims=True)
        e = jnp.exp(s - m)
        p = e * pl.reciprocal(jnp.sum(e, axis=-1, keepdims=True), approx=True)

        ctx = jnp.dot(p.astype(jnp.bfloat16), v.astype(jnp.bfloat16),
                      preferred_element_type=jnp.float32)          # (TQ, hd)
        # Per-head slice of the output projection, accumulated over heads.
        return acc + jnp.dot(ctx.astype(jnp.bfloat16), wo_ref[h],
                             preferred_element_type=jnp.float32)   # (TQ, D)

    acc = jnp.zeros((tq, d_model), jnp.float32)
    if num_heads <= 8:                       # short fixed trip-count: unroll
        for h in range(num_heads):
            acc = head_body(h, acc)
    else:                                    # many heads: rolled loop
        acc = lax.fori_loop(0, num_heads, head_body, acc)

    # Bias + residual + LayerNorm epilogue (f32), lane-dense (TQ, D) store.
    z = x_q_ref[...] + acc + bo_ref[...]
    mu = jnp.mean(z, axis=-1, keepdims=True)
    zc = z - mu
    var = jnp.mean(zc * zc, axis=-1, keepdims=True)
    out_ref[...] = (zc * lax.rsqrt(var + jnp.float32(1e-5))
                    ) * gamma_ref[...] + beta_ref[...]


def sparse_attention_pallas(x, params, num_heads, sparsity, *, tq=None):
    """params = (Wq^T, bq, Wk^T, bk, Wv^T, bv, Wo^T, bo, gamma, beta);
    weights are (D_in, D_out), biases / LN params are (1, D)."""
    B, S, D = x.shape
    assert D % num_heads == 0
    hd = D // num_heads
    if tq is None:
        tq = S if S <= 128 else 128
    assert S % tq == 0, "seq_len must be divisible by the query tile"
    nq = S // tq
    tk = tq
    hw = sparsity // 2                       # band half-width
    nb = min(pl.cdiv(hw, tk), nq - 1)        # neighbor KV blocks on each side
    lk = (2 * nb + 1) * tk                   # KV window length

    (wq, bq, wk, bk, wv, bv, wo, bo, gamma, beta) = params
    cdt = jnp.bfloat16

    # Head split done once in the wrapper (pure layout plumbing in XLA).
    def split_in(w):                          # (D, D) -> (H, D, hd)
        return w.reshape(D, num_heads, hd).transpose(1, 0, 2).astype(cdt)

    def split_b(b_):                          # (1, D) -> (H, 1, hd), f32
        return b_.reshape(num_heads, hd)[:, None, :].astype(jnp.float32)

    wq_h, wk_h, wv_h = split_in(wq), split_in(wk), split_in(wv)
    bq_h, bk_h, bv_h = split_b(bq), split_b(bk), split_b(bv)
    wo_h = wo.reshape(num_heads, hd, D).astype(cdt)   # (H, hd, D)

    kernel = functools.partial(
        _banded_attention_kernel, num_heads=num_heads, head_dim=hd,
        tq=tq, tk=tk, nb=nb, hw=hw, seq_len=S, lk=lk)

    x_q_spec = pl.BlockSpec((None, tq, D), lambda b, qi: (b, qi, 0))

    def nbr_spec(o):
        def idx(b, qi, _o=o):
            j = jnp.maximum(jnp.minimum(qi + _o, nq - 1), 0)
            return (b, j, 0)
        return pl.BlockSpec((None, tk, D), idx)

    # Whole-array weight blocks with constant index_maps: fetched to VMEM once
    # for the entire grid (no per-step weight re-DMA).
    def whole(shape):
        n = len(shape)
        return pl.BlockSpec(shape, lambda b, qi, _n=n: (0,) * _n)

    in_specs = [x_q_spec]
    in_specs += [nbr_spec(o) for o in range(-nb, 0)]
    in_specs += [nbr_spec(o) for o in range(1, nb + 1)]
    in_specs += [
        whole(wq_h.shape), whole(bq_h.shape),
        whole(wk_h.shape), whole(bk_h.shape),
        whole(wv_h.shape), whole(bv_h.shape),
        whole(wo_h.shape),
        whole((1, D)), whole((1, D)), whole((1, D)),
    ]

    inputs = ([x] + [x] * (2 * nb) +
              [wq_h, bq_h, wk_h, bk_h, wv_h, bv_h, wo_h,
               bo.astype(jnp.float32), gamma.astype(jnp.float32),
               beta.astype(jnp.float32)])

    return pl.pallas_call(
        kernel,
        out_shape=jax.ShapeDtypeStruct((B, S, D), jnp.float32),
        grid_spec=pltpu.PrefetchScalarGridSpec(
            num_scalar_prefetch=0,
            grid=(B, nq),
            in_specs=in_specs,
            out_specs=pl.BlockSpec((None, tq, D), lambda b, qi: (b, qi, 0)),
            scratch_shapes=[
                pltpu.VMEM((lk, D), cdt),            # staged in-band KV window
            ]),
        compiler_params=pltpu.CompilerParams(
            dimension_semantics=("parallel", "parallel"),
            vmem_limit_bytes=64 * 1024 * 1024),
    )(*inputs)


def make_sparse_mask(seq_len, sparsity):
    mask = np.zeros((seq_len, seq_len), dtype=np.float32)
    for i in range(seq_len):
        start = max(0, i - sparsity // 2)
        end = min(seq_len, i + sparsity // 2 + 1)
        mask[i, start:end] = 1.0
    return jnp.asarray(mask)


def sparse_attention_ref(x, params, mask, num_heads):
    """Pure-JAX (f32) reference mirroring the PyTorch forward (eval mode)."""
    (wq, bq, wk, bk, wv, bv, wo, bo, gamma, beta) = params
    B, S, D = x.shape
    hd = D // num_heads
    q = (x @ wq + bq).reshape(B, S, num_heads, hd).transpose(0, 2, 1, 3)
    k = (x @ wk + bk).reshape(B, S, num_heads, hd).transpose(0, 2, 1, 3)
    v = (x @ wv + bv).reshape(B, S, num_heads, hd).transpose(0, 2, 1, 3)
    s = jnp.einsum('bhqd,bhkd->bhqk', q, k) / math.sqrt(hd)
    s = jnp.where(mask[None, None] == 0, -1e30, s)
    p = jax.nn.softmax(s, axis=-1)
    o = jnp.einsum('bhqk,bhkd->bhqd', p, v).transpose(0, 2, 1, 3).reshape(B, S, D)
    o = o @ wo + bo
    z = x + o
    mu = jnp.mean(z, axis=-1, keepdims=True)
    var = jnp.mean((z - mu) ** 2, axis=-1, keepdims=True)
    return (z - mu) / jnp.sqrt(var + 1e-5) * gamma + beta


if __name__ == "__main__":
    # Small shapes consistent with the module: B=2, S=16, d_model=32, heads=4.
    # S=16 with TQ=8 exercises the banded query-tiling path (2 query blocks,
    # one in-band neighbor KV block on each side).
    B, S, D = 2, 16, 32
    num_heads = 4
    sparsity = 4

    key = jax.random.PRNGKey(0)
    ks = jax.random.split(key, 10)

    def w(k):   # weight pre-transposed: (D_in, D_out)
        return jax.random.normal(k, (D, D), jnp.float32) * 0.05

    def b(k):
        return jax.random.normal(k, (1, D), jnp.float32) * 0.05

    params = (
        w(ks[0]), b(ks[1]),          # query
        w(ks[2]), b(ks[3]),          # key
        w(ks[4]), b(ks[5]),          # value
        w(ks[6]), b(ks[7]),          # fc_out
        jnp.ones((1, D), jnp.float32),   # LayerNorm gamma
        jnp.zeros((1, D), jnp.float32),  # LayerNorm beta
    )

    x = jax.random.normal(ks[8], (B, S, D), jnp.float32)

    out = sparse_attention_pallas(x, params, num_heads, sparsity, tq=8)
    out = jax.block_until_ready(out)

    ref = sparse_attention_ref(x, params, make_sparse_mask(S, sparsity), num_heads)
    assert out.shape == (B, S, D)
    max_err = float(jnp.max(jnp.abs(out - ref)))
    # bf16 MXU inputs + approx reciprocal -> small deviation vs the f32 reference.
    assert max_err < 2e-2, f"mismatch vs reference: max abs err {max_err}"

    print("KERNEL_OK")
</pallas_src>

<mosaic_0001>
module attributes {stable_mosaic.version = 11 : i64} {
  func.func @_banded_attention_kernel(%arg0: i32, %arg1: i32, %arg2: memref<1x8x32xf32, #tpu.memory_space<vmem>>, %arg3: memref<1x8x32xf32, #tpu.memory_space<vmem>>, %arg4: memref<1x8x32xf32, #tpu.memory_space<vmem>>, %arg5: memref<4x32x8xbf16, #tpu.memory_space<vmem>>, %arg6: memref<4x1x8xf32, #tpu.memory_space<vmem>>, %arg7: memref<4x32x8xbf16, #tpu.memory_space<vmem>>, %arg8: memref<4x1x8xf32, #tpu.memory_space<vmem>>, %arg9: memref<4x32x8xbf16, #tpu.memory_space<vmem>>, %arg10: memref<4x1x8xf32, #tpu.memory_space<vmem>>, %arg11: memref<4x8x32xbf16, #tpu.memory_space<vmem>>, %arg12: memref<1x32xf32, #tpu.memory_space<vmem>>, %arg13: memref<1x32xf32, #tpu.memory_space<vmem>>, %arg14: memref<1x32xf32, #tpu.memory_space<vmem>>, %arg15: memref<1x8x32xf32, #tpu.memory_space<vmem>>, %arg16: memref<24x32xbf16, #tpu.memory_space<vmem>>) attributes {dimension_semantics = [#tpu.dimension_semantics<parallel>, #tpu.dimension_semantics<parallel>], iteration_bounds = array<i64: 2, 2>, scalar_prefetch = 0 : i64, scratch_operands = 1 : i64, tpu.core_type = #tpu.core_type<tc>, window_params = [{transform_indices = @transform_0, window_bounds = array<i64: 1, 8, 32>}, {transform_indices = @transform_1, window_bounds = array<i64: 1, 8, 32>}, {transform_indices = @transform_2, window_bounds = array<i64: 1, 8, 32>}, {pipeline_mode = #tpu.pipeline_mode<synchronous>, transform_indices = @transform_3, window_bounds = array<i64: 4, 32, 8>}, {pipeline_mode = #tpu.pipeline_mode<synchronous>, transform_indices = @transform_4, window_bounds = array<i64: 4, 1, 8>}, {pipeline_mode = #tpu.pipeline_mode<synchronous>, transform_indices = @transform_5, window_bounds = array<i64: 4, 32, 8>}, {pipeline_mode = #tpu.pipeline_mode<synchronous>, transform_indices = @transform_6, window_bounds = array<i64: 4, 1, 8>}, {pipeline_mode = #tpu.pipeline_mode<synchronous>, transform_indices = @transform_7, window_bounds = array<i64: 4, 32, 8>}, {pipeline_mode = #tpu.pipeline_mode<synchronous>, transform_indices = @transform_8, window_bounds = array<i64: 4, 1, 8>}, {pipeline_mode = #tpu.pipeline_mode<synchronous>, transform_indices = @transform_9, window_bounds = array<i64: 4, 8, 32>}, {pipeline_mode = #tpu.pipeline_mode<synchronous>, transform_indices = @transform_10, window_bounds = array<i64: 1, 32>}, {pipeline_mode = #tpu.pipeline_mode<synchronous>, transform_indices = @transform_11, window_bounds = array<i64: 1, 32>}, {pipeline_mode = #tpu.pipeline_mode<synchronous>, transform_indices = @transform_12, window_bounds = array<i64: 1, 32>}, {transform_indices = @transform_13, window_bounds = array<i64: 1, 8, 32>}]} {
    %c0 = arith.constant 0 : index
    %c0_0 = arith.constant 0 : index
    %c0_1 = arith.constant 0 : index
    %0 = vector.load %arg3[%c0, %c0_0, %c0_1] : memref<1x8x32xf32, #tpu.memory_space<vmem>>, vector<1x8x32xf32>
    %1 = vector.shape_cast %0 : vector<1x8x32xf32> to vector<8x32xf32>
    %2 = arith.truncf %1 : vector<8x32xf32> to vector<8x32xbf16>
    %c0_2 = arith.constant 0 : index
    %c0_3 = arith.constant 0 : index
    %3 = vector.load %arg16[%c0_2, %c0_3] : memref<24x32xbf16, #tpu.memory_space<vmem>>, vector<8x32xbf16>
    tpu.vector_store %arg16[%c0_2, %c0_3], %2 {strides = array<i32>} : memref<24x32xbf16, #tpu.memory_space<vmem>>, vector<8x32xbf16>,
    %c0_4 = arith.constant 0 : index
    %c0_5 = arith.constant 0 : index
    %c0_6 = arith.constant 0 : index
    %4 = vector.load %arg2[%c0_4, %c0_5, %c0_6] : memref<1x8x32xf32, #tpu.memory_space<vmem>>, vector<1x8x32xf32>
    %5 = vector.shape_cast %4 : vector<1x8x32xf32> to vector<8x32xf32>
    %6 = arith.truncf %5 : vector<8x32xf32> to vector<8x32xbf16>
    %c8 = arith.constant 8 : index
    %c0_7 = arith.constant 0 : index
    %7 = vector.load %arg16[%c8, %c0_7] : memref<24x32xbf16, #tpu.memory_space<vmem>>, vector<8x32xbf16>
    tpu.vector_store %arg16[%c8, %c0_7], %6 {strides = array<i32>} : memref<24x32xbf16, #tpu.memory_space<vmem>>, vector<8x32xbf16>,
    %c0_8 = arith.constant 0 : index
    %c0_9 = arith.constant 0 : index
    %c0_10 = arith.constant 0 : index
    %8 = vector.load %arg4[%c0_8, %c0_9, %c0_10] : memref<1x8x32xf32, #tpu.memory_space<vmem>>, vector<1x8x32xf32>
    %9 = vector.shape_cast %8 : vector<1x8x32xf32> to vector<8x32xf32>
    %10 = arith.truncf %9 : vector<8x32xf32> to vector<8x32xbf16>
    %c16 = arith.constant 16 : index
    %c0_11 = arith.constant 0 : index
    %11 = vector.load %arg16[%c16, %c0_11] : memref<24x32xbf16, #tpu.memory_space<vmem>>, vector<8x32xbf16>
    tpu.vector_store %arg16[%c16, %c0_11], %10 {strides = array<i32>} : memref<24x32xbf16, #tpu.memory_space<vmem>>, vector<8x32xbf16>,
    %c8_i32 = arith.constant 8 : i32
    %12 = arith.muli %arg1, %c8_i32 : i32
    %13 = tpu.iota {dimensions = array<i32: 0>} : vector<8x24xi32>
    %14 = vector.broadcast %12 : i32 to vector<8x24xi32>
    %15 = arith.addi %14, %13 : vector<8x24xi32>
    %c1_i32 = arith.constant 1 : i32
    %16 = arith.subi %arg1, %c1_i32 : i32
    %c8_i32_12 = arith.constant 8 : i32
    %17 = arith.muli %16, %c8_i32_12 : i32
    %18 = tpu.iota {dimensions = array<i32: 1>} : vector<8x24xi32>
    %19 = vector.broadcast %17 : i32 to vector<8x24xi32>
    %20 = arith.addi %19, %18 : vector<8x24xi32>
    %c0_i32 = arith.constant 0 : i32
    %21 = vector.broadcast %c0_i32 : i32 to vector<8x24xi32>
    %22 = arith.cmpi sge, %20, %21 : vector<8x24xi32>
    %c16_i32 = arith.constant 16 : i32
    %23 = vector.broadcast %c16_i32 : i32 to vector<8x24xi32>
    %24 = arith.cmpi slt, %20, %23 : vector<8x24xi32>
    %25 = arith.andi %22, %24 : vector<8x24xi1>
    %c2_i32 = arith.constant 2 : i32
    %26 = vector.broadcast %c2_i32 : i32 to vector<8x24xi32>
    %27 = arith.subi %15, %26 : vector<8x24xi32>
    %28 = arith.cmpi sge, %20, %27 : vector<8x24xi32>
    %29 = arith.andi %25, %28 : vector<8x24xi1>
    %c2_i32_13 = arith.constant 2 : i32
    %30 = vector.broadcast %c2_i32_13 : i32 to vector<8x24xi32>
    %31 = arith.addi %15, %30 : vector<8x24xi32>
    %32 = arith.cmpi sle, %20, %31 : vector<8x24xi32>
    %33 = arith.andi %29, %32 : vector<8x24xi1>
    %cst = arith.constant 0.000000e+00 : f32
    %cst_14 = arith.constant -1.000000e+30 : f32
    %34 = vector.broadcast %cst : f32 to vector<8x24xf32>
    %35 = vector.broadcast %cst_14 : f32 to vector<8x24xf32>
    %36 = arith.select %33, %34, %35 : vector<8x24xi1>, vector<8x24xf32>
    %c8_15 = arith.constant 8 : index
    %c0_16 = arith.constant 0 : index
    %37 = vector.load %arg16[%c8_15, %c0_16] : memref<24x32xbf16, #tpu.memory_space<vmem>>, vector<8x32xbf16>
    %c0_17 = arith.constant 0 : index
    %c0_18 = arith.constant 0 : index
    %38 = vector.load %arg16[%c0_17, %c0_18] : memref<24x32xbf16, #tpu.memory_space<vmem>>, vector<24x32xbf16>
    %cst_19 = arith.constant 0.000000e+00 : f32
    %39 = vector.broadcast %cst_19 : f32 to vector<8x32xf32>
    %c0_20 = arith.constant 0 : index
    %c0_21 = arith.constant 0 : index
    %c0_22 = arith.constant 0 : index
    %40 = vector.load %arg5[%c0_20, %c0_21, %c0_22] : memref<4x32x8xbf16, #tpu.memory_space<vmem>>, vector<1x32x8xbf16>
    %41 = vector.shape_cast %40 : vector<1x32x8xbf16> to vector<32x8xbf16>
    %cst_23 = arith.constant dense<0.000000e+00> : vector<8x8xf32>
    %42 = tpu.matmul %37, %41, %cst_23 {dimension_numbers = #tpu.dot_dimension_numbers<[1], [0], [0], [1], [0, 0, 1, 1], [], []>} : vector<8x32xbf16>, vector<32x8xbf16>, vector<8x8xf32> -> vector<8x8xf32>
    %c0_24 = arith.constant 0 : index
    %c0_25 = arith.constant 0 : index
    %c0_26 = arith.constant 0 : index
    %43 = vector.load %arg6[%c0_24, %c0_25, %c0_26] : memref<4x1x8xf32, #tpu.memory_space<vmem>>, vector<1x1x8xf32>
    %44 = vector.shape_cast %43 : vector<1x1x8xf32> to vector<1x8xf32>
    %45 = vector.broadcast %44 : vector<1x8xf32> to vector<8x8xf32>
    %46 = arith.addf %42, %45 : vector<8x8xf32>
    %cst_27 = arith.constant 0.353553385 : f32
    %47 = vector.broadcast %cst_27 : f32 to vector<8x8xf32>
    %48 = arith.mulf %46, %47 : vector<8x8xf32>
    %c0_28 = arith.constant 0 : index
    %c0_29 = arith.constant 0 : index
    %c0_30 = arith.constant 0 : index
    %49 = vector.load %arg7[%c0_28, %c0_29, %c0_30] : memref<4x32x8xbf16, #tpu.memory_space<vmem>>, vector<1x32x8xbf16>
    %50 = vector.shape_cast %49 : vector<1x32x8xbf16> to vector<32x8xbf16>
    %cst_31 = arith.constant dense<0.000000e+00> : vector<24x8xf32>
    %51 = tpu.matmul %38, %50, %cst_31 {dimension_numbers = #tpu.dot_dimension_numbers<[1], [0], [0], [1], [0, 0, 1, 1], [], []>} : vector<24x32xbf16>, vector<32x8xbf16>, vector<24x8xf32> -> vector<24x8xf32>
    %c0_32 = arith.constant 0 : index
    %c0_33 = arith.constant 0 : index
    %c0_34 = arith.constant 0 : index
    %52 = vector.load %arg8[%c0_32, %c0_33, %c0_34] : memref<4x1x8xf32, #tpu.memory_space<vmem>>, vector<1x1x8xf32>
    %53 = vector.shape_cast %52 : vector<1x1x8xf32> to vector<1x8xf32>
    %54 = vector.broadcast %53 : vector<1x8xf32> to vector<24x8xf32>
    %55 = arith.addf %51, %54 : vector<24x8xf32>
    %c0_35 = arith.constant 0 : index
    %c0_36 = arith.constant 0 : index
    %c0_37 = arith.constant 0 : index
    %56 = vector.load %arg9[%c0_35, %c0_36, %c0_37] : memref<4x32x8xbf16, #tpu.memory_space<vmem>>, vector<1x32x8xbf16>
    %57 = vector.shape_cast %56 : vector<1x32x8xbf16> to vector<32x8xbf16>
    %cst_38 = arith.constant dense<0.000000e+00> : vector<24x8xf32>
    %58 = tpu.matmul %38, %57, %cst_38 {dimension_numbers = #tpu.dot_dimension_numbers<[1], [0], [0], [1], [0, 0, 1, 1], [], []>} : vector<24x32xbf16>, vector<32x8xbf16>, vector<24x8xf32> -> vector<24x8xf32>
    %c0_39 = arith.constant 0 : index
    %c0_40 = arith.constant 0 : index
    %c0_41 = arith.constant 0 : index
    %59 = vector.load %arg10[%c0_39, %c0_40, %c0_41] : memref<4x1x8xf32, #tpu.memory_space<vmem>>, vector<1x1x8xf32>
    %60 = vector.shape_cast %59 : vector<1x1x8xf32> to vector<1x8xf32>
    %61 = vector.broadcast %60 : vector<1x8xf32> to vector<24x8xf32>
    %62 = arith.addf %58, %61 : vector<24x8xf32>
    %63 = arith.truncf %48 : vector<8x8xf32> to vector<8x8xbf16>
    %64 = arith.truncf %55 : vector<24x8xf32> to vector<24x8xbf16>
    %cst_42 = arith.constant dense<0.000000e+00> : vector<8x24xf32>
    %65 = tpu.matmul %63, %64, %cst_42 {dimension_numbers = #tpu.dot_dimension_numbers<[1], [1], [0], [0], [0, 0, 1, 0], [], []>} : vector<8x8xbf16>, vector<24x8xbf16>, vector<8x24xf32> -> vector<8x24xf32>
    %66 = arith.addf %65, %36 : vector<8x24xf32>
    %cst_43 = arith.constant dense<0xFF800000> : vector<8xf32>
    %67 = vector.multi_reduction <maximumf>, %66, %cst_43 [1] : vector<8x24xf32> to vector<8xf32>
    %68 = vector.shape_cast %67 : vector<8xf32> to vector<8x1xf32>
    %69 = vector.broadcast %68 : vector<8x1xf32> to vector<8x24xf32>
    %70 = arith.subf %66, %69 : vector<8x24xf32>
    %71 = math.exp %70 : vector<8x24xf32>
    %cst_44 = arith.constant dense<0.000000e+00> : vector<8xf32>
    %72 = vector.multi_reduction <add>, %71, %cst_44 [1] : vector<8x24xf32> to vector<8xf32>
    %73 = vector.shape_cast %72 : vector<8xf32> to vector<8x1xf32>
    %74 = tpu.reciprocal %73 {approx = true} : vector<8x1xf32> -> vector<8x1xf32>
    %75 = vector.broadcast %74 : vector<8x1xf32> to vector<8x24xf32>
    %76 = arith.mulf %71, %75 : vector<8x24xf32>
    %77 = arith.truncf %76 : vector<8x24xf32> to vector<8x24xbf16>
    %78 = arith.truncf %62 : vector<24x8xf32> to vector<24x8xbf16>
    %cst_45 = arith.constant dense<0.000000e+00> : vector<8x8xf32>
    %79 = tpu.matmul %77, %78, %cst_45 {dimension_numbers = #tpu.dot_dimension_numbers<[1], [0], [0], [1], [0, 0, 1, 1], [], []>} : vector<8x24xbf16>, vector<24x8xbf16>, vector<8x8xf32> -> vector<8x8xf32>
    %80 = arith.truncf %79 : vector<8x8xf32> to vector<8x8xbf16>
    %c0_46 = arith.constant 0 : index
    %c0_47 = arith.constant 0 : index
    %c0_48 = arith.constant 0 : index
    %81 = vector.load %arg11[%c0_46, %c0_47, %c0_48] : memref<4x8x32xbf16, #tpu.memory_space<vmem>>, vector<1x8x32xbf16>
    %82 = vector.shape_cast %81 : vector<1x8x32xbf16> to vector<8x32xbf16>
    %cst_49 = arith.constant dense<0.000000e+00> : vector<8x32xf32>
    %83 = tpu.matmul %80, %82, %cst_49 {dimension_numbers = #tpu.dot_dimension_numbers<[1], [0], [0], [1], [0, 0, 1, 1], [], []>} : vector<8x8xbf16>, vector<8x32xbf16>, vector<8x32xf32> -> vector<8x32xf32>
    %84 = arith.addf %39, %83 : vector<8x32xf32>
    %c1 = arith.constant 1 : index
    %c0_50 = arith.constant 0 : index
    %c0_51 = arith.constant 0 : index
    %85 = vector.load %arg5[%c1, %c0_50, %c0_51] : memref<4x32x8xbf16, #tpu.memory_space<vmem>>, vector<1x32x8xbf16>
    %86 = vector.shape_cast %85 : vector<1x32x8xbf16> to vector<32x8xbf16>
    %cst_52 = arith.constant dense<0.000000e+00> : vector<8x8xf32>
    %87 = tpu.matmul %37, %86, %cst_52 {dimension_numbers = #tpu.dot_dimension_numbers<[1], [0], [0], [1], [0, 0, 1, 1], [], []>} : vector<8x32xbf16>, vector<32x8xbf16>, vector<8x8xf32> -> vector<8x8xf32>
    %c1_53 = arith.constant 1 : index
    %c0_54 = arith.constant 0 : index
    %c0_55 = arith.constant 0 : index
    %88 = vector.load %arg6[%c1_53, %c0_54, %c0_55] : memref<4x1x8xf32, #tpu.memory_space<vmem>>, vector<1x1x8xf32>
    %89 = vector.shape_cast %88 : vector<1x1x8xf32> to vector<1x8xf32>
    %90 = vector.broadcast %89 : vector<1x8xf32> to vector<8x8xf32>
    %91 = arith.addf %87, %90 : vector<8x8xf32>
    %cst_56 = arith.constant 0.353553385 : f32
    %92 = vector.broadcast %cst_56 : f32 to vector<8x8xf32>
    %93 = arith.mulf %91, %92 : vector<8x8xf32>
    %c1_57 = arith.constant 1 : index
    %c0_58 = arith.constant 0 : index
    %c0_59 = arith.constant 0 : index
    %94 = vector.load %arg7[%c1_57, %c0_58, %c0_59] : memref<4x32x8xbf16, #tpu.memory_space<vmem>>, vector<1x32x8xbf16>
    %95 = vector.shape_cast %94 : vector<1x32x8xbf16> to vector<32x8xbf16>
    %cst_60 = arith.constant dense<0.000000e+00> : vector<24x8xf32>
    %96 = tpu.matmul %38, %95, %cst_60 {dimension_numbers = #tpu.dot_dimension_numbers<[1], [0], [0], [1], [0, 0, 1, 1], [], []>} : vector<24x32xbf16>, vector<32x8xbf16>, vector<24x8xf32> -> vector<24x8xf32>
    %c1_61 = arith.constant 1 : index
    %c0_62 = arith.constant 0 : index
    %c0_63 = arith.constant 0 : index
    %97 = vector.load %arg8[%c1_61, %c0_62, %c0_63] : memref<4x1x8xf32, #tpu.memory_space<vmem>>, vector<1x1x8xf32>
    %98 = vector.shape_cast %97 : vector<1x1x8xf32> to vector<1x8xf32>
    %99 = vector.broadcast %98 : vector<1x8xf32> to vector<24x8xf32>
    %100 = arith.addf %96, %99 : vector<24x8xf32>
    %c1_64 = arith.constant 1 : index
    %c0_65 = arith.constant 0 : index
    %c0_66 = arith.constant 0 : index
    %101 = vector.load %arg9[%c1_64, %c0_65, %c0_66] : memref<4x32x8xbf16, #tpu.memory_space<vmem>>, vector<1x32x8xbf16>
    %102 = vector.shape_cast %101 : vector<1x32x8xbf16> to vector<32x8xbf16>
    %cst_67 = arith.constant dense<0.000000e+00> : vector<24x8xf32>
    %103 = tpu.matmul %38, %102, %cst_67 {dimension_numbers = #tpu.dot_dimension_numbers<[1], [0], [0], [1], [0, 0, 1, 1], [], []>} : vector<24x32xbf16>, vector<32x8xbf16>, vector<24x8xf32> -> vector<24x8xf32>
    %c1_68 = arith.constant 1 : index
    %c0_69 = arith.constant 0 : index
    %c0_70 = arith.constant 0 : index
    %104 = vector.load %arg10[%c1_68, %c0_69, %c0_70] : memref<4x1x8xf32, #tpu.memory_space<vmem>>, vector<1x1x8xf32>
    %105 = vector.shape_cast %104 : vector<1x1x8xf32> to vector<1x8xf32>
    %106 = vector.broadcast %105 : vector<1x8xf32> to vector<24x8xf32>
    %107 = arith.addf %103, %106 : vector<24x8xf32>
    %108 = arith.truncf %93 : vector<8x8xf32> to vector<8x8xbf16>
    %109 = arith.truncf %100 : vector<24x8xf32> to vector<24x8xbf16>
    %cst_71 = arith.constant dense<0.000000e+00> : vector<8x24xf32>
    %110 = tpu.matmul %108, %109, %cst_71 {dimension_numbers = #tpu.dot_dimension_numbers<[1], [1], [0], [0], [0, 0, 1, 0], [], []>} : vector<8x8xbf16>, vector<24x8xbf16>, vector<8x24xf32> -> vector<8x24xf32>
    %111 = arith.addf %110, %36 : vector<8x24xf32>
    %cst_72 = arith.constant dense<0xFF800000> : vector<8xf32>
    %112 = vector.multi_reduction <maximumf>, %111, %cst_72 [1] : vector<8x24xf32> to vector<8xf32>
    %113 = vector.shape_cast %112 : vector<8xf32> to vector<8x1xf32>
    %114 = vector.broadcast %113 : vector<8x1xf32> to vector<8x24xf32>
    %115 = arith.subf %111, %114 : vector<8x24xf32>
    %116 = math.exp %115 : vector<8x24xf32>
    %cst_73 = arith.constant dense<0.000000e+00> : vector<8xf32>
    %117 = vector.multi_reduction <add>, %116, %cst_73 [1] : vector<8x24xf32> to vector<8xf32>
    %118 = vector.shape_cast %117 : vector<8xf32> to vector<8x1xf32>
    %119 = tpu.reciprocal %118 {approx = true} : vector<8x1xf32> -> vector<8x1xf32>
    %120 = vector.broadcast %119 : vector<8x1xf32> to vector<8x24xf32>
    %121 = arith.mulf %116, %120 : vector<8x24xf32>
    %122 = arith.truncf %121 : vector<8x24xf32> to vector<8x24xbf16>
    %123 = arith.truncf %107 : vector<24x8xf32> to vector<24x8xbf16>
    %cst_74 = arith.constant dense<0.000000e+00> : vector<8x8xf32>
    %124 = tpu.matmul %122, %123, %cst_74 {dimension_numbers = #tpu.dot_dimension_numbers<[1], [0], [0], [1], [0, 0, 1, 1], [], []>} : vector<8x24xbf16>, vector<24x8xbf16>, vector<8x8xf32> -> vector<8x8xf32>
    %125 = arith.truncf %124 : vector<8x8xf32> to vector<8x8xbf16>
    %c1_75 = arith.constant 1 : index
    %c0_76 = arith.constant 0 : index
    %c0_77 = arith.constant 0 : index
    %126 = vector.load %arg11[%c1_75, %c0_76, %c0_77] : memref<4x8x32xbf16, #tpu.memory_space<vmem>>, vector<1x8x32xbf16>
    %127 = vector.shape_cast %126 : vector<1x8x32xbf16> to vector<8x32xbf16>
    %cst_78 = arith.constant dense<0.000000e+00> : vector<8x32xf32>
    %128 = tpu.matmul %125, %127, %cst_78 {dimension_numbers = #tpu.dot_dimension_numbers<[1], [0], [0], [1], [0, 0, 1, 1], [], []>} : vector<8x8xbf16>, vector<8x32xbf16>, vector<8x32xf32> -> vector<8x32xf32>
    %129 = arith.addf %84, %128 : vector<8x32xf32>
    %c2 = arith.constant 2 : index
    %c0_79 = arith.constant 0 : index
    %c0_80 = arith.constant 0 : index
    %130 = vector.load %arg5[%c2, %c0_79, %c0_80] : memref<4x32x8xbf16, #tpu.memory_space<vmem>>, vector<1x32x8xbf16>
    %131 = vector.shape_cast %130 : vector<1x32x8xbf16> to vector<32x8xbf16>
    %cst_81 = arith.constant dense<0.000000e+00> : vector<8x8xf32>
    %132 = tpu.matmul %37, %131, %cst_81 {dimension_numbers = #tpu.dot_dimension_numbers<[1], [0], [0], [1], [0, 0, 1, 1], [], []>} : vector<8x32xbf16>, vector<32x8xbf16>, vector<8x8xf32> -> vector<8x8xf32>
    %c2_82 = arith.constant 2 : index
    %c0_83 = arith.constant 0 : index
    %c0_84 = arith.constant 0 : index
    %133 = vector.load %arg6[%c2_82, %c0_83, %c0_84] : memref<4x1x8xf32, #tpu.memory_space<vmem>>, vector<1x1x8xf32>
    %134 = vector.shape_cast %133 : vector<1x1x8xf32> to vector<1x8xf32>
    %135 = vector.broadcast %134 : vector<1x8xf32> to vector<8x8xf32>
    %136 = arith.addf %132, %135 : vector<8x8xf32>
    %cst_85 = arith.constant 0.353553385 : f32
    %137 = vector.broadcast %cst_85 : f32 to vector<8x8xf32>
    %138 = arith.mulf %136, %137 : vector<8x8xf32>
    %c2_86 = arith.constant 2 : index
    %c0_87 = arith.constant 0 : index
    %c0_88 = arith.constant 0 : index
    %139 = vector.load %arg7[%c2_86, %c0_87, %c0_88] : memref<4x32x8xbf16, #tpu.memory_space<vmem>>, vector<1x32x8xbf16>
    %140 = vector.shape_cast %139 : vector<1x32x8xbf16> to vector<32x8xbf16>
    %cst_89 = arith.constant dense<0.000000e+00> : vector<24x8xf32>
    %141 = tpu.matmul %38, %140, %cst_89 {dimension_numbers = #tpu.dot_dimension_numbers<[1], [0], [0], [1], [0, 0, 1, 1], [], []>} : vector<24x32xbf16>, vector<32x8xbf16>, vector<24x8xf32> -> vector<24x8xf32>
    %c2_90 = arith.constant 2 : index
    %c0_91 = arith.constant 0 : index
    %c0_92 = arith.constant 0 : index
    %142 = vector.load %arg8[%c2_90, %c0_91, %c0_92] : memref<4x1x8xf32, #tpu.memory_space<vmem>>, vector<1x1x8xf32>
    %143 = vector.shape_cast %142 : vector<1x1x8xf32> to vector<1x8xf32>
    %144 = vector.broadcast %143 : vector<1x8xf32> to vector<24x8xf32>
    %145 = arith.addf %141, %144 : vector<24x8xf32>
    %c2_93 = arith.constant 2 : index
    %c0_94 = arith.constant 0 : index
    %c0_95 = arith.constant 0 : index
    %146 = vector.load %arg9[%c2_93, %c0_94, %c0_95] : memref<4x32x8xbf16, #tpu.memory_space<vmem>>, vector<1x32x8xbf16>
    %147 = vector.shape_cast %146 : vector<1x32x8xbf16> to vector<32x8xbf16>
    %cst_96 = arith.constant dense<0.000000e+00> : vector<24x8xf32>
    %148 = tpu.matmul %38, %147, %cst_96 {dimension_numbers = #tpu.dot_dimension_numbers<[1], [0], [0], [1], [0, 0, 1, 1], [], []>} : vector<24x32xbf16>, vector<32x8xbf16>, vector<24x8xf32> -> vector<24x8xf32>
    %c2_97 = arith.constant 2 : index
    %c0_98 = arith.constant 0 : index
    %c0_99 = arith.constant 0 : index
    %149 = vector.load %arg10[%c2_97, %c0_98, %c0_99] : memref<4x1x8xf32, #tpu.memory_space<vmem>>, vector<1x1x8xf32>
    %150 = vector.shape_cast %149 : vector<1x1x8xf32> to vector<1x8xf32>
    %151 = vector.broadcast %150 : vector<1x8xf32> to vector<24x8xf32>
    %152 = arith.addf %148, %151 : vector<24x8xf32>
    %153 = arith.truncf %138 : vector<8x8xf32> to vector<8x8xbf16>
    %154 = arith.truncf %145 : vector<24x8xf32> to vector<24x8xbf16>
    %cst_100 = arith.constant dense<0.000000e+00> : vector<8x24xf32>
    %155 = tpu.matmul %153, %154, %cst_100 {dimension_numbers = #tpu.dot_dimension_numbers<[1], [1], [0], [0], [0, 0, 1, 0], [], []>} : vector<8x8xbf16>, vector<24x8xbf16>, vector<8x24xf32> -> vector<8x24xf32>
    %156 = arith.addf %155, %36 : vector<8x24xf32>
    %cst_101 = arith.constant dense<0xFF800000> : vector<8xf32>
    %157 = vector.multi_reduction <maximumf>, %156, %cst_101 [1] : vector<8x24xf32> to vector<8xf32>
    %158 = vector.shape_cast %157 : vector<8xf32> to vector<8x1xf32>
    %159 = vector.broadcast %158 : vector<8x1xf32> to vector<8x24xf32>
    %160 = arith.subf %156, %159 : vector<8x24xf32>
    %161 = math.exp %160 : vector<8x24xf32>
    %cst_102 = arith.constant dense<0.000000e+00> : vector<8xf32>
    %162 = vector.multi_reduction <add>, %161, %cst_102 [1] : vector<8x24xf32> to vector<8xf32>
    %163 = vector.shape_cast %162 : vector<8xf32> to vector<8x1xf32>
    %164 = tpu.reciprocal %163 {approx = true} : vector<8x1xf32> -> vector<8x1xf32>
    %165 = vector.broadcast %164 : vector<8x1xf32> to vector<8x24xf32>
    %166 = arith.mulf %161, %165 : vector<8x24xf32>
    %167 = arith.truncf %166 : vector<8x24xf32> to vector<8x24xbf16>
    %168 = arith.truncf %152 : vector<24x8xf32> to vector<24x8xbf16>
    %cst_103 = arith.constant dense<0.000000e+00> : vector<8x8xf32>
    %169 = tpu.matmul %167, %168, %cst_103 {dimension_numbers = #tpu.dot_dimension_numbers<[1], [0], [0], [1], [0, 0, 1, 1], [], []>} : vector<8x24xbf16>, vector<24x8xbf16>, vector<8x8xf32> -> vector<8x8xf32>
    %170 = arith.truncf %169 : vector<8x8xf32> to vector<8x8xbf16>
    %c2_104 = arith.constant 2 : index
    %c0_105 = arith.constant 0 : index
    %c0_106 = arith.constant 0 : index
    %171 = vector.load %arg11[%c2_104, %c0_105, %c0_106] : memref<4x8x32xbf16, #tpu.memory_space<vmem>>, vector<1x8x32xbf16>
    %172 = vector.shape_cast %171 : vector<1x8x32xbf16> to vector<8x32xbf16>
    %cst_107 = arith.constant dense<0.000000e+00> : vector<8x32xf32>
    %173 = tpu.matmul %170, %172, %cst_107 {dimension_numbers = #tpu.dot_dimension_numbers<[1], [0], [0], [1], [0, 0, 1, 1], [], []>} : vector<8x8xbf16>, vector<8x32xbf16>, vector<8x32xf32> -> vector<8x32xf32>
    %174 = arith.addf %129, %173 : vector<8x32xf32>
    %c3 = arith.constant 3 : index
    %c0_108 = arith.constant 0 : index
    %c0_109 = arith.constant 0 : index
    %175 = vector.load %arg5[%c3, %c0_108, %c0_109] : memref<4x32x8xbf16, #tpu.memory_space<vmem>>, vector<1x32x8xbf16>
    %176 = vector.shape_cast %175 : vector<1x32x8xbf16> to vector<32x8xbf16>
    %cst_110 = arith.constant dense<0.000000e+00> : vector<8x8xf32>
    %177 = tpu.matmul %37, %176, %cst_110 {dimension_numbers = #tpu.dot_dimension_numbers<[1], [0], [0], [1], [0, 0, 1, 1], [], []>} : vector<8x32xbf16>, vector<32x8xbf16>, vector<8x8xf32> -> vector<8x8xf32>
    %c3_111 = arith.constant 3 : index
    %c0_112 = arith.constant 0 : index
    %c0_113 = arith.constant 0 : index
    %178 = vector.load %arg6[%c3_111, %c0_112, %c0_113] : memref<4x1x8xf32, #tpu.memory_space<vmem>>, vector<1x1x8xf32>
    %179 = vector.shape_cast %178 : vector<1x1x8xf32> to vector<1x8xf32>
    %180 = vector.broadcast %179 : vector<1x8xf32> to vector<8x8xf32>
    %181 = arith.addf %177, %180 : vector<8x8xf32>
    %cst_114 = arith.constant 0.353553385 : f32
    %182 = vector.broadcast %cst_114 : f32 to vector<8x8xf32>
    %183 = arith.mulf %181, %182 : vector<8x8xf32>
    %c3_115 = arith.constant 3 : index
    %c0_116 = arith.constant 0 : index
    %c0_117 = arith.constant 0 : index
    %184 = vector.load %arg7[%c3_115, %c0_116, %c0_117] : memref<4x32x8xbf16, #tpu.memory_space<vmem>>, vector<1x32x8xbf16>
    %185 = vector.shape_cast %184 : vector<1x32x8xbf16> to vector<32x8xbf16>
    %cst_118 = arith.constant dense<0.000000e+00> : vector<24x8xf32>
    %186 = tpu.matmul %38, %185, %cst_118 {dimension_numbers = #tpu.dot_dimension_numbers<[1], [0], [0], [1], [0, 0, 1, 1], [], []>} : vector<24x32xbf16>, vector<32x8xbf16>, vector<24x8xf32> -> vector<24x8xf32>
    %c3_119 = arith.constant 3 : index
    %c0_120 = arith.constant 0 : index
    %c0_121 = arith.constant 0 : index
    %187 = vector.load %arg8[%c3_119, %c0_120, %c0_121] : memref<4x1x8xf32, #tpu.memory_space<vmem>>, vector<1x1x8xf32>
    %188 = vector.shape_cast %187 : vector<1x1x8xf32> to vector<1x8xf32>
    %189 = vector.broadcast %188 : vector<1x8xf32> to vector<24x8xf32>
    %190 = arith.addf %186, %189 : vector<24x8xf32>
    %c3_122 = arith.constant 3 : index
    %c0_123 = arith.constant 0 : index
    %c0_124 = arith.constant 0 : index
    %191 = vector.load %arg9[%c3_122, %c0_123, %c0_124] : memref<4x32x8xbf16, #tpu.memory_space<vmem>>, vector<1x32x8xbf16>
    %192 = vector.shape_cast %191 : vector<1x32x8xbf16> to vector<32x8xbf16>
    %cst_125 = arith.constant dense<0.000000e+00> : vector<24x8xf32>
    %193 = tpu.matmul %38, %192, %cst_125 {dimension_numbers = #tpu.dot_dimension_numbers<[1], [0], [0], [1], [0, 0, 1, 1], [], []>} : vector<24x32xbf16>, vector<32x8xbf16>, vector<24x8xf32> -> vector<24x8xf32>
    %c3_126 = arith.constant 3 : index
    %c0_127 = arith.constant 0 : index
    %c0_128 = arith.constant 0 : index
    %194 = vector.load %arg10[%c3_126, %c0_127, %c0_128] : memref<4x1x8xf32, #tpu.memory_space<vmem>>, vector<1x1x8xf32>
    %195 = vector.shape_cast %194 : vector<1x1x8xf32> to vector<1x8xf32>
    %196 = vector.broadcast %195 : vector<1x8xf32> to vector<24x8xf32>
    %197 = arith.addf %193, %196 : vector<24x8xf32>
    %198 = arith.truncf %183 : vector<8x8xf32> to vector<8x8xbf16>
    %199 = arith.truncf %190 : vector<24x8xf32> to vector<24x8xbf16>
    %cst_129 = arith.constant dense<0.000000e+00> : vector<8x24xf32>
    %200 = tpu.matmul %198, %199, %cst_129 {dimension_numbers = #tpu.dot_dimension_numbers<[1], [1], [0], [0], [0, 0, 1, 0], [], []>} : vector<8x8xbf16>, vector<24x8xbf16>, vector<8x24xf32> -> vector<8x24xf32>
    %201 = arith.addf %200, %36 : vector<8x24xf32>
    %cst_130 = arith.constant dense<0xFF800000> : vector<8xf32>
    %202 = vector.multi_reduction <maximumf>, %201, %cst_130 [1] : vector<8x24xf32> to vector<8xf32>
    %203 = vector.shape_cast %202 : vector<8xf32> to vector<8x1xf32>
    %204 = vector.broadcast %203 : vector<8x1xf32> to vector<8x24xf32>
    %205 = arith.subf %201, %204 : vector<8x24xf32>
    %206 = math.exp %205 : vector<8x24xf32>
    %cst_131 = arith.constant dense<0.000000e+00> : vector<8xf32>
    %207 = vector.multi_reduction <add>, %206, %cst_131 [1] : vector<8x24xf32> to vector<8xf32>
    %208 = vector.shape_cast %207 : vector<8xf32> to vector<8x1xf32>
    %209 = tpu.reciprocal %208 {approx = true} : vector<8x1xf32> -> vector<8x1xf32>
    %210 = vector.broadcast %209 : vector<8x1xf32> to vector<8x24xf32>
    %211 = arith.mulf %206, %210 : vector<8x24xf32>
    %212 = arith.truncf %211 : vector<8x24xf32> to vector<8x24xbf16>
    %213 = arith.truncf %197 : vector<24x8xf32> to vector<24x8xbf16>
    %cst_132 = arith.constant dense<0.000000e+00> : vector<8x8xf32>
    %214 = tpu.matmul %212, %213, %cst_132 {dimension_numbers = #tpu.dot_dimension_numbers<[1], [0], [0], [1], [0, 0, 1, 1], [], []>} : vector<8x24xbf16>, vector<24x8xbf16>, vector<8x8xf32> -> vector<8x8xf32>
    %215 = arith.truncf %214 : vector<8x8xf32> to vector<8x8xbf16>
    %c3_133 = arith.constant 3 : index
    %c0_134 = arith.constant 0 : index
    %c0_135 = arith.constant 0 : index
    %216 = vector.load %arg11[%c3_133, %c0_134, %c0_135] : memref<4x8x32xbf16, #tpu.memory_space<vmem>>, vector<1x8x32xbf16>
    %217 = vector.shape_cast %216 : vector<1x8x32xbf16> to vector<8x32xbf16>
    %cst_136 = arith.constant dense<0.000000e+00> : vector<8x32xf32>
    %218 = tpu.matmul %215, %217, %cst_136 {dimension_numbers = #tpu.dot_dimension_numbers<[1], [0], [0], [1], [0, 0, 1, 1], [], []>} : vector<8x8xbf16>, vector<8x32xbf16>, vector<8x32xf32> -> vector<8x32xf32>
    %219 = arith.addf %174, %218 : vector<8x32xf32>
    %c0_137 = arith.constant 0 : index
    %c0_138 = arith.constant 0 : index
    %c0_139 = arith.constant 0 : index
    %220 = vector.load %arg2[%c0_137, %c0_138, %c0_139] : memref<1x8x32xf32, #tpu.memory_space<vmem>>, vector<1x8x32xf32>
    %221 = vector.shape_cast %220 : vector<1x8x32xf32> to vector<8x32xf32>
    %222 = arith.addf %221, %219 : vector<8x32xf32>
    %c0_140 = arith.constant 0 : index
    %c0_141 = arith.constant 0 : index
    %223 = vector.load %arg12[%c0_140, %c0_141] : memref<1x32xf32, #tpu.memory_space<vmem>>, vector<1x32xf32>
    %224 = vector.broadcast %223 : vector<1x32xf32> to vector<8x32xf32>
    %225 = arith.addf %222, %224 : vector<8x32xf32>
    %cst_142 = arith.constant dense<0.000000e+00> : vector<8xf32>
    %226 = vector.multi_reduction <add>, %225, %cst_142 [1] : vector<8x32xf32> to vector<8xf32>
    %227 = vector.shape_cast %226 : vector<8xf32> to vector<8x1xf32>
    %cst_143 = arith.constant 3.200000e+01 : f32
    %228 = vector.broadcast %cst_143 : f32 to vector<8x1xf32>
    %229 = arith.divf %227, %228 : vector<8x1xf32>
    %230 = vector.broadcast %229 : vector<8x1xf32> to vector<8x32xf32>
    %231 = arith.subf %225, %230 : vector<8x32xf32>
    %232 = arith.mulf %231, %231 : vector<8x32xf32>
    %cst_144 = arith.constant dense<0.000000e+00> : vector<8xf32>
    %233 = vector.multi_reduction <add>, %232, %cst_144 [1] : vector<8x32xf32> to vector<8xf32>
    %234 = vector.shape_cast %233 : vector<8xf32> to vector<8x1xf32>
    %cst_145 = arith.constant 3.200000e+01 : f32
    %235 = vector.broadcast %cst_145 : f32 to vector<8x1xf32>
    %236 = arith.divf %234, %235 : vector<8x1xf32>
    %cst_146 = arith.constant 9.99999974E-6 : f32
    %237 = vector.broadcast %cst_146 : f32 to vector<8x1xf32>
    %238 = arith.addf %236, %237 : vector<8x1xf32>
    %239 = math.rsqrt %238 : vector<8x1xf32>
    %240 = vector.broadcast %239 : vector<8x1xf32> to vector<8x32xf32>
    %241 = arith.mulf %231, %240 : vector<8x32xf32>
    %c0_147 = arith.constant 0 : index
    %c0_148 = arith.constant 0 : index
    %242 = vector.load %arg13[%c0_147, %c0_148] : memref<1x32xf32, #tpu.memory_space<vmem>>, vector<1x32xf32>
    %243 = vector.broadcast %242 : vector<1x32xf32> to vector<8x32xf32>
    %244 = arith.mulf %241, %243 : vector<8x32xf32>
    %c0_149 = arith.constant 0 : index
    %c0_150 = arith.constant 0 : index
    %245 = vector.load %arg14[%c0_149, %c0_150] : memref<1x32xf32, #tpu.memory_space<vmem>>, vector<1x32xf32>
    %246 = vector.broadcast %245 : vector<1x32xf32> to vector<8x32xf32>
    %247 = arith.addf %244, %246 : vector<8x32xf32>
    %c0_151 = arith.constant 0 : index
    %c0_152 = arith.constant 0 : index
    %c0_153 = arith.constant 0 : index
    %248 = vector.load %arg15[%c0_151, %c0_152, %c0_153] : memref<1x8x32xf32, #tpu.memory_space<vmem>>, vector<1x8x32xf32>
    %249 = vector.shape_cast %248 : vector<1x8x32xf32> to vector<8x32xf32>
    %250 = vector.shape_cast %247 : vector<8x32xf32> to vector<1x8x32xf32>
    tpu.vector_store %arg15[%c0_151, %c0_152, %c0_153], %250 {strides = array<i32>} : memref<1x8x32xf32, #tpu.memory_space<vmem>>, vector<1x8x32xf32>,
    return
  }
  func.func @transform_0(%arg0: i32, %arg1: i32) -> (i32, i32, i32) {
    %c0_i32 = arith.constant 0 : i32
    %c0_i32_0 = arith.constant 0 : i32
    return %arg0, %arg1, %c0_i32 : i32, i32, i32
  }
  func.func @transform_1(%arg0: i32, %arg1: i32) -> (i32, i32, i32) {
    %c-1_i32 = arith.constant -1 : i32
    %0 = arith.addi %arg1, %c-1_i32 : i32
    %c1_i32 = arith.constant 1 : i32
    %1 = arith.minsi %0, %c1_i32 : i32
    %c0_i32 = arith.constant 0 : i32
    %2 = arith.maxsi %1, %c0_i32 : i32
    %c0_i32_0 = arith.constant 0 : i32
    %c0_i32_1 = arith.constant 0 : i32
    return %arg0, %2, %c0_i32_0 : i32, i32, i32
  }
  func.func @transform_2(%arg0: i32, %arg1: i32) -> (i32, i32, i32) {
    %c1_i32 = arith.constant 1 : i32
    %0 = arith.addi %arg1, %c1_i32 : i32
    %c1_i32_0 = arith.constant 1 : i32
    %1 = arith.minsi %0, %c1_i32_0 : i32
    %c0_i32 = arith.constant 0 : i32
    %2 = arith.maxsi %1, %c0_i32 : i32
    %c0_i32_1 = arith.constant 0 : i32
    %c0_i32_2 = arith.constant 0 : i32
    return %arg0, %2, %c0_i32_1 : i32, i32, i32
  }
  func.func @transform_3(%arg0: i32, %arg1: i32) -> (i32, i32, i32) {
    %c0_i32 = arith.constant 0 : i32
    %c0_i32_0 = arith.constant 0 : i32
    %c0_i32_1 = arith.constant 0 : i32
    %c0_i32_2 = arith.constant 0 : i32
    return %c0_i32, %c0_i32_0, %c0_i32_1 : i32, i32, i32
  }
  func.func @transform_4(%arg0: i32, %arg1: i32) -> (i32, i32, i32) {
    %c0_i32 = arith.constant 0 : i32
    %c0_i32_0 = arith.constant 0 : i32
    %c0_i32_1 = arith.constant 0 : i32
    %c0_i32_2 = arith.constant 0 : i32
    return %c0_i32, %c0_i32_0, %c0_i32_1 : i32, i32, i32
  }
  func.func @transform_5(%arg0: i32, %arg1: i32) -> (i32, i32, i32) {
    %c0_i32 = arith.constant 0 : i32
    %c0_i32_0 = arith.constant 0 : i32
    %c0_i32_1 = arith.constant 0 : i32
    %c0_i32_2 = arith.constant 0 : i32
    return %c0_i32, %c0_i32_0, %c0_i32_1 : i32, i32, i32
  }
  func.func @transform_6(%arg0: i32, %arg1: i32) -> (i32, i32, i32) {
    %c0_i32 = arith.constant 0 : i32
    %c0_i32_0 = arith.constant 0 : i32
    %c0_i32_1 = arith.constant 0 : i32
    %c0_i32_2 = arith.constant 0 : i32
    return %c0_i32, %c0_i32_0, %c0_i32_1 : i32, i32, i32
  }
  func.func @transform_7(%arg0: i32, %arg1: i32) -> (i32, i32, i32) {
    %c0_i32 = arith.constant 0 : i32
    %c0_i32_0 = arith.constant 0 : i32
    %c0_i32_1 = arith.constant 0 : i32
    %c0_i32_2 = arith.constant 0 : i32
    return %c0_i32, %c0_i32_0, %c0_i32_1 : i32, i32, i32
  }
  func.func @transform_8(%arg0: i32, %arg1: i32) -> (i32, i32, i32) {
    %c0_i32 = arith.constant 0 : i32
    %c0_i32_0 = arith.constant 0 : i32
    %c0_i32_1 = arith.constant 0 : i32
    %c0_i32_2 = arith.constant 0 : i32
    return %c0_i32, %c0_i32_0, %c0_i32_1 : i32, i32, i32
  }
  func.func @transform_9(%arg0: i32, %arg1: i32) -> (i32, i32, i32) {
    %c0_i32 = arith.constant 0 : i32
    %c0_i32_0 = arith.constant 0 : i32
    %c0_i32_1 = arith.constant 0 : i32
    %c0_i32_2 = arith.constant 0 : i32
    return %c0_i32, %c0_i32_0, %c0_i32_1 : i32, i32, i32
  }
  func.func @transform_10(%arg0: i32, %arg1: i32) -> (i32, i32) {
    %c0_i32 = arith.constant 0 : i32
    %c0_i32_0 = arith.constant 0 : i32
    %c0_i32_1 = arith.constant 0 : i32
    return %c0_i32, %c0_i32_0 : i32, i32
  }
  func.func @transform_11(%arg0: i32, %arg1: i32) -> (i32, i32) {
    %c0_i32 = arith.constant 0 : i32
    %c0_i32_0 = arith.constant 0 : i32
    %c0_i32_1 = arith.constant 0 : i32
    return %c0_i32, %c0_i32_0 : i32, i32
  }
  func.func @transform_12(%arg0: i32, %arg1: i32) -> (i32, i32) {
    %c0_i32 = arith.constant 0 : i32
    %c0_i32_0 = arith.constant 0 : i32
    %c0_i32_1 = arith.constant 0 : i32
    return %c0_i32, %c0_i32_0 : i32, i32
  }
  func.func @transform_13(%arg0: i32, %arg1: i32) -> (i32, i32, i32) {
    %c0_i32 = arith.constant 0 : i32
    %c0_i32_0 = arith.constant 0 : i32
    return %arg0, %arg1, %c0_i32 : i32, i32, i32
  }
}

</mosaic_0001>

<bundles_post_ra>
// kernel: tpu_custom_call.1
= control target key start
LH: loop header
LB: loop body
LE: loop exit
PB: predicated region body
PF: predicated region fallthrough
CT: control target
= control target key end

     0   :  { %s3482_s0 = inlined_call_operand.vmem [shape: f32[2,16,32], index: 0, kind: input, shape index: {}]   ;;  %s3483_s1 = inlined_call_operand.vmem [shape: f32[2,16,32], index: 1, kind: input, shape index: {}]   ;;  %s3484_s2 = inlined_call_operand.vmem [shape: f32[2,16,32], index: 2, kind: input, shape index: {}]   ;;  %s3485_s3 = inlined_call_operand.vmem [shape: bf16[4,32,8], index: 3, kind: input, shape index: {}]   ;;  %s3486_s4 = inlined_call_operand.vmem [shape: f32[4,1,8], index: 4, kind: input, shape index: {}]   ;;  %s3487_s5 = inlined_call_operand.vmem [shape: bf16[4,32,8], index: 5, kind: input, shape index: {}]   ;;  %s3488_s6 = inlined_call_operand.vmem [shape: f32[4,1,8], index: 6, kind: input, shape index: {}]   ;;  %s3489_s7 = inlined_call_operand.vmem [shape: bf16[4,32,8], index: 7, kind: input, shape index: {}]   ;;  %s3490_s8 = inlined_call_operand.vmem [shape: f32[4,1,8], index: 8, kind: input, shape index: {}]   ;;  %s3491_s9 = inlined_call_operand.vmem [shape: bf16[4,8,32], index: 9, kind: input, shape index: {}]   ;;  %s3492_s10 = inlined_call_operand.vmem [shape: f32[1,32], index: 10, kind: input, shape index: {}]   ;;  %s3493_s11 = inlined_call_operand.vmem [shape: f32[1,32], index: 11, kind: input, shape index: {}]   ;;  %s3494_s12 = inlined_call_operand.vmem [shape: f32[1,32], index: 12, kind: input, shape index: {}]   ;;  %s3495_s13 = inlined_call_operand.hbm [shape: f32[2,16,32], index: 13, kind: output, shape index: {}]  }
   0x1   :  { %3502 = sst [smem:[#allocation13_spill]] %s3482_s0 }
   0x2   :  { %3503 = sst [smem:[#allocation14_spill]] %s3483_s1 }
   0x3   :  { %18 = vsyncpa [#allocation4], 0 }
   0x4   :  { %20 = vsyncpa [#allocation4 + $0x1], 0  ;;  %s3040_s25 = smov 0   ;;  %s3042_s26 = smov 0  }
   0x5   :  { %s3044_s27 = smov 0   ;;  %s3046_s28 = smov 0  }
   0x6   :  { %s3048_s29 = smov 0   ;;  %s3050_s30 = smov 0  }
   0x7   :  { %s3052_s14 = smov 0   ;;  %s3054_s15 = smov 0  }
   0x8 LB: > { %3504 = sst [smem:[#allocation6_spill]] %s2936_s25  ;;  %s2310_s16 = sadd.s32 4294967295, %s2964_s15   ;;  %s2964_s15 = sphi %s3054_s15, %s26_s15   ;;  %s2960_s14 = sphi %s3052_s14, %s3521_s14   ;;  %s2956_s30 = sphi %s3050_s30, %s3520_s30   ;;  %s2952_s29 = sphi %s3048_s29, %s3519_s29   ;;  %s2948_s28 = sphi %s3046_s28, %s3518_s28   ;;  %s2944_s27 = sphi %s3044_s27, %s3524_s27   ;;  %s2940_s26 = sphi %s3042_s26, %s3523_s26   ;;  %s2936_s25 = sphi %s3040_s25, %s3522_s25  }
   0x9   : > { %3505 = sst [smem:[#allocation7_spill]] %s2956_s30  ;;  %s2311_s17 = sadd.s32 4294967294, %s2964_s15  }
   0xa   : > { %3506 = sst [smem:[#allocation8_spill]] %s2960_s14  ;;  %s35_s18 = sadd.s32 1, %s2956_s30 }
   0xb   : > { %p36_p0 = scmp.ge.s32.totalorder %s35_s18, 2  ;;  %s38_s19 = sadd.s32 1, %s2960_s14 }
   0xc   : > { %p371_p1 = scmp.ne.s32.totalorder %s2944_s27, %s2940_s26  ;;  %p372_p2 = scmp.eq.s32.totalorder %s2310_s16, 3 }
   0xd   : > { %s3526_s18 = smov (%p36_p0, %s35_s18), 0  ;;  %s3528_s19 = smov (!%p36_p0, %s38_s19), %s2960_s14 }
   0xe   : > { %3507 = sst [smem:[#allocation9_spill]] %s3526_s18  ;;  %s357_s20 = ssub.s32 %s2956_s30, %s3526_s18 }
   0xf   : > { %p3091_p3 = por %p372_p2, %p371_p1  ;;  %p40_p4 = scmp.ge.s32.totalorder %s3528_s19, 2 }
  0x10   : > { %p377_p5 = scmp.ne.s32.totalorder %s2940_s26, %s2936_s25  ;;  %p378_p6 = scmp.eq.s32.totalorder %s2311_s17, 3 }
  0x11   : > { %p2334_p7 = scmp.ge.s32.totalorder %s2964_s15, 1  ;;  %s3530_s19 = smov (%p40_p4, %s3528_s19), 0 }
  0x12   : > { %3509 = sst [smem:[#allocation10_spill]] %s3530_s19  ;;  %p3100_p8 = por %p378_p6, %p377_p5 }
  0x13   : > { %p479_p9 = scmp.lt.s32.totalorder %s2964_s15, 5  ;;  %s356_s23 = ssub.s32 %s2960_s14, %s3530_s19 }
  0x14   : > { %s3510_s22 = scalar_select %p3100_p8, 1, 0 }
  0x15   : > { %s361_s24 = sadd.s32 1, %s2944_s27  ;;  %s358_s16 = sor.u32 %s357_s20, %s356_s23 }
  0x16   : > { %3511 = sst [smem:[#allocation11_spill]] %s3510_s22  ;;  %p480_p10 = pnand %p2334_p7, %p479_p9 }
  0x17   : > { %p359_p11 = scmp.eq.s32.totalorder %s358_s16, 0  ;;  %p552_p12 = scmp.lt.s32.totalorder (!%p480_p10), %s2952_s29, 1 }
  0x18   : > { %483 = sbr.rel (%p480_p10) target bundleno = 4047 (0xfcf), region = 72  ;;  %p554_p13 = scmp.lt.s32.totalorder (!%p480_p10), %s2948_s28, 1 }
  0x19   : > { %s3109_s18 = scalar_select %p359_p11, %s2944_s27, %s361_s24  }
  0x1a   : > { %s3128_s16 = sadd.s32 (!%p480_p10), 4294967295, %s2948_s28  ;;  %s3513_s0 = sld [smem:[#allocation13_spill]] (!%p480_p10) }
  0x1b   : > { %3512 = sst [smem:[#allocation12_spill]] %s3109_s18  ;;  %p561_p0 = scmp.lt.s32.totalorder (!%p480_p10), %s3128_s16, 1 }
  0x1c   : > { %p2338_p1 = scmp.gt.s32.totalorder (!%p480_p10), %s3128_s16, 0  ;;  %s3514_s1 = sld [smem:[#allocation14_spill]] (!%p480_p10) }
  0x1d   : > { %v2828_v0 = vld [vmem:[%s3487_s5 + $0x8] sm:$0xff]   ;;  %v2829_v1 = vld [vmem:[%s3487_s5] sm:$0xff]   ;;  %s553_s20 = scalar_select %p552_p12, %s2952_s29, 1  ;;  %v2966_v2 = vmov 0.0   ;;  %vm2967_vm0 = vmmov 0   ;;  %vm599_vm1 = vcmask 257024   ;;  %v608_v37 = vlaneseq }
  0x1e   : > { %2578 = vmatprep.subr.bf16.mxu1 %v2828_v0  ;;  %s555_s23 = scalar_select %p554_p13, %s2948_s28, 1  ;;  %2570 = vmatprep.subr.bf16.mxu0 %v2966_v2  ;;  %v2832_v3 = vld [vmem:[%s3485_s3 + $0x8] sm:$0xff]   ;;  %v2833_v4 = vld [vmem:[%s3485_s3] sm:$0xff]   ;;  %vm654_vm2 = vcmask 261120   ;;  %vm858_vm3 = vcmask 64512   ;;  %vm908_vm11 = vcmask 195584  }
  0x1f   : > { %2579 = vmatpush3.bf16.msra.mxu1 %v2828_v0  ;;  %s3125_s24 = sshll.u32 %s553_s20, 1  ;;  %2571 = vmatpush3.bf16.msra.mxu0 %v2832_v3  ;;  %v2360_v19 = vld [vmem:[%s3488_s6] ss:$0 sm:$0xff]  ;;  %v2834_v35 = vld [vmem:[%s3489_s7 + $0x8] sm:$0xff]   ;;  %v609_v38 = vshrl.u32 %v608_v37, 7  ;;  %v615_v40 = vand.u32 127, %v608_v37 }
  0x20   : > { %2580 = vmatprep.subr.bf16.mxu1 %v2829_v1  ;;  %s557_s22 = sadd.s32 %s3125_s24, %s555_s23  ;;  %2574 = vmatprep.mubr.msk.bf16.mxu0 %vm2967_vm0, %v2966_v2  ;;  %s578_s23 = sadd.s32 1, %s2948_s28  ;;  %v2356_v27 = vld [vmem:[%s3486_s4] ss:$0 sm:$0xff]  ;;  %v2968_v46 = vmov -1e+30   ;;  %v2836_v54 = vld [vmem:[%s3487_s5 + $0x18] sm:$0xff]  }
  0x21   : > { %s2337_s25 = sshll.u32 %s557_s22, 3  ;;  %2572 = vmatprep.subr.bf16.mxu0 %v2966_v2  ;;  %p579_p2 = scmp.lt.s32.totalorder %s578_s23, 1  ;;  %v2835_v36 = vld [vmem:[%s3489_s7] sm:$0xff]   ;;  %vm926_vm12 = vcmask 1043456  }
  0x22   : > { %s559_s14 = scalar_lea.vmem %s3513_s0, %s2337_s25  ;;  %p2345_p4 = scmp.gt.s32.totalorder %s578_s23, 0  ;;  %v2367_v55 = vld [vmem:[%s3490_s8] ss:$0 sm:$0xff] }
  0x23   : > { %2581 = vmatpush3.bf16.msra.mxu1 %v2829_v1  ;;  %s562_s18 = scalar_select %p561_p0, %s3128_s16, 1  ;;  %v3144_v5 = vld [vmem:[%s559_s14] sm:$0xff]  ;;  %2573 = vmatpush3.bf16.msra.mxu0 %v2833_v4  ;;  %v2837_v1 = vld [vmem:[%s3487_s5 + $0x10] sm:$0xff]  }
  0x24   : > { %2594 = vmatprep.subr.bf16.mxu1 %v2966_v2  ;;  %v602_v6 = vpack.c.bf16 %v3144_v5, %v3144_v5  ;;  %s3534_s23 = smov (!%p579_p2, %s578_s23), 1  ;;  %2586 = vmatprep.subr.bf16.mxu0 %v2834_v35  ;;  %s549_s22 = sand.u32 1, %s2940_s26  }
  0x25   : > { %s3532_s18 = smov (!%p2338_p1, %s562_s18), 0  ;;  %s3536_s23 = smov (!%p2345_p4, %s3534_s23), 0 }
  0x26   : > { %603 = vst.msk [vmem:[#allocation2 + $0x4] sm:$0xf] %vm599_vm1, %v602_v6  ;;  %p567_p5 = scmp.lt.s32.totalorder %s3532_s18, 1  ;;  %p585_p6 = scmp.lt.s32.totalorder %s3536_s23, 1 }
  0x27   : > { %s2335_s17 = sshll.u32 %s549_s22, 3 }
  0x28   : > { %s3538_s18 = smov (!%p567_p5, %s3532_s18), 1  ;;  %s3540_s23 = smov (!%p585_p6, %s3536_s23), 1 }
  0x29   : > { %s570_s19 = sadd.s32 %s3125_s24, %s3538_s18  ;;  %s588_s20 = sadd.s32 %s3125_s24, %s3540_s23 }
  0x2a   : > { %s2344_s14 = sshll.u32 %s570_s19, 3  ;;  %s2351_s30 = sshll.u32 %s588_s20, 3 }
  0x2b   : > { %s572_s25 = scalar_lea.vmem %s3514_s1, %s2344_s14  ;;  %s590_s19 = scalar_lea.vmem %s3484_s2, %s2351_s30 }
  0x2c   : > { %v597_v8 = vld [vmem:[%s572_s25] sm:$0xff]  ;;  %s2352_s30 = sshll.u32 %s2948_s28, 3  ;;  %s2354_s18 = sshll.u32 %s3128_s16, 3 }
  0x2d   : > { %v3154_v7 = vld [vmem:[#allocation2 + $0x4] sm:$0xf]  ;;  %v598_v9 = vpack.c.bf16 %v597_v8, %v597_v8  ;;  %v610_v39 = vstv %s2352_s30  ;;  %v616_v41 = vstv %s2354_s18  ;;  %s2478_s25 = sshll.u32 %s2952_s29, 1  ;;  %s551_s24 = scalar_lea.vmem [#allocation3], %s2335_s17 }
  0x2e   : > { %2575 = vmatmul.mubr.msk.bf16.vlgmr.msra.gmra.mxu0 %vm654_vm2, %v3154_v7  ;;  %v604_v10 = vld [vmem:[%s590_s19] sm:$0xff]  ;;  %v611_v42 = vadd.s32 %v610_v39, %v609_v38  ;;  %v617_v43 = vadd.s32 %v616_v41, %v615_v40  ;;  %s2192_s20 = sadd.s32 %s2948_s28, %s2478_s25  ;;  %s2196_s23 = sshll.u32 %s551_s24, 4  ;;  %s2197_s23 = int_to_ptr.vmem [resolvable:$true] %s2196_s23 }
  0x2f   : > { %600 = vst.msk [vmem:[#allocation2] sm:$0xf] %vm599_vm1, %v598_v9  ;;  %v605_v11 = vpack.c.bf16 %v604_v10, %v604_v10  ;;  %2587 = vmatpush3.bf16.msra.mxu0 %v2834_v35  ;;  %v2379_v35 = vld [vmem:[%s3486_s4 + $0x1] ss:$0 sm:$0xff]  ;;  %s2479_s0 = sshll.u32 %s2192_s20, 7  ;;  %s2181_s29 = scalar_lea.sflag [#allocation4], %s549_s22 }
  0x30   : > { %2588 = vmatprep.subr.bf16.mxu0 %v2835_v36  ;;  %v2355_v44 = vadd.s32 4294967294, %v611_v42  ;;  %vm618_vm4 = vcmp.ge.s32.totalorder %v617_v43, 0  ;;  %vm619_vm5 = vcmp.lt.s32.totalorder %v617_v43, 16  ;;  %v624_v45 = vadd.s32 2, %v611_v42  ;;  %v971_v39 = vld [vmem:[%s3491_s9] sm:$0xf]  ;;  %s2194_s28 = scalar_lea.hbm %s3495_s13, %s2479_s0 }
  0x31   : > { %606 = vst.msk [vmem:[#allocation2 + $0x8] sm:$0xf] %vm599_vm1, %v605_v11  ;;  %vm620_vm6 = vmand %vm618_vm4, %vm619_vm5  ;;  %s2872_s25 = scalar_lea.vmem %s2197_s23, 128  ;;  %s2969_s30 = smov [#allocation3]  }
  0x32   : > { %vm622_vm7 = vcmp.ge.s32.totalorder %v617_v43, %v2355_v44  ;;  %vm625_vm9 = vcmp.le.s32.totalorder %v617_v43, %v624_v45  ;;  %v1349_v43 = vsel %vm926_vm12, %v971_v39, 0  ;;  %p2873_p7 = scmp.ne.s32.totalorder %s2197_s23, %s2872_s25  ;;  %s2876_s18 = sshll.u32 %s2969_s30, 4  ;;  %s2877_s18 = int_to_ptr.vmem [resolvable:$false] %s2876_s18 }
  0x33   : > { %2589 = vmatpush3.bf16.msra.mxu0 %v2835_v36  ;;  %vm623_vm8 = vmand %vm620_vm6, %vm622_vm7  ;;  %s2878_s17 = scalar_lea.vmem %s2877_s18, 256  ;;  %p2879_p11 = scmp.lt.s32.totalorder %s2197_s23, %s2877_s18 }
  0x34   : > { %2602 = vmatprep.subr.bf16.mxu0 %v2966_v2  ;;  %vm626_vm10 = vmand %vm623_vm8, %vm625_vm9  ;;  %p2874_p9 = pnand %p2873_p7, %p3091_p3  ;;  %p2880_p12 = scmp.lt.s32.totalorder %s2878_s17, %s2872_s25 }
  0x35   : > { %v3202_v47 = vsel %vm626_vm10, 0.0, %v2968_v46  ;;  %v2840_v46 = vld [vmem:[%s3489_s7 + $0x18] sm:$0xff]  }
  0x36   : > { %v629_v12 = vld [vmem:[#allocation2] sm:$0xf]  ;;  %p2875_p10 = pneg %p2874_p9  ;;  %p2881_p13 = por %p2880_p12, %p2879_p11 }
  0x37   : > { %v3165_v13 = vcombine.low %v629_v12, %v3154_v7 }
  0x38   : > { %v3171_v14 = vld [vmem:[#allocation2 + $0x8] ss:$0 sps:$4 sm:$0xff]   ;;  %p2882_p0 = pnand %p2881_p13, %p2875_p10 }
  0x39   : > { %2582 = vmatprep.mubr.msk.bf16.mxu1 %vm654_vm2, %v3165_v13  ;;  %2590 = vmatprep.mubr.msk.bf16.mxu0 %vm654_vm2, %v3165_v13 }
  0x3a   : > { %2583 = vmatmul.mubr.msk.bf16.vlgmr.msra.gmra.mxu1 %vm654_vm2, %v3171_v14  ;;  %2591 = vmatmul.mubr.msk.bf16.vlgmr.msra.gmra.mxu0 %vm654_vm2, %v3171_v14 }
  0x3b   : > { %2598 = vmatprep.mubr.msk.bf16.mxu1 %vm2967_vm0, %v2966_v2  ;;  %2606 = vmatprep.mubr.msk.bf16.mxu0 %vm2967_vm0, %v2966_v2 }
  0xee   : > { %v692_v15 = vpop.f32.mrf.mxu0 }
  0xef   : > { %v693_v31 = vadd.f32 %v2356_v27, %v692_v15 }
  0xf0   : > { %v2576_v16 = vpop.f32.mrf.mxu0 }
  0xf1   : > { %v698_v32 = vmul.f32 0.35355338, %v693_v31  ;;  %v2838_v16 = vld [vmem:[%s3485_s3 + $0x18] sm:$0xff]  }
  0xf2   : > { %v695_v17 = vpop.f32.mrf.mxu0 }
  0xf3   : > { %v855_v34 = vpack.c.bf16 %v698_v32, %v698_v32 }
  0xf4   : > { %v2577_v18 = vpop.f32.mrf.mxu0 }
  0xf5   : > { %v2839_v18 = vld [vmem:[%s3485_s3 + $0x10] sm:$0xff]  }
  0xfa   : > { %v2584_v20 = vpop.f32.mrf.mxu1  ;;  %v2592_v56 = vpop.f32.mrf.mxu0 }
  0xfb   : > { %v779_v21 = vadd.f32 %v2584_v20, %v2360_v19  ;;  %v850_v57 = vadd.f32 %v2592_v56, %v2367_v55 }
  0xfc   : > { %v770_v22 = vpop.f32.mrf.mxu1  ;;  %v841_v3 = vpop.f32.mrf.mxu0 }
  0xfd   : > { %v857_v23 = vpack.c.bf16 %v779_v21, %v779_v21  ;;  %v771_v28 = vadd.f32 %v2360_v19, %v770_v22  ;;  %v922_v58 = vpack.c.bf16 %v850_v57, %v850_v57  ;;  %v842_v6 = vadd.f32 %v2367_v55, %v841_v3 }
  0xfe   : > { %v2585_v24 = vpop.f32.mrf.mxu1  ;;  %v2593_v4 = vpop.f32.mrf.mxu0 }
  0xff   : > { %v866_v25 = vsel %vm858_vm3, %v857_v23, 0  ;;  %v928_v59 = vsel %vm926_vm12, %v922_v58, 0 }
 0x100   : > { %v773_v26 = vpop.f32.mrf.mxu1  ;;  %2595 = vmatpush3.bf16.xpose.msra.mxu1 %v866_v25  ;;  %2603 = vmatpush3.bf16.msra.mxu0 %v928_v59  ;;  %v844_v8 = vpop.f32.mrf.mxu0  ;;  %v2398_v59 = vld [vmem:[%s3490_s8 + $0x1] ss:$0 sm:$0xff] }
 0x101   : > { %v774_v29 = vadd.f32 %v2360_v19, %v773_v26  ;;  %2596 = vmatprep.subr.bf16.mxu1 %v2966_v2  ;;  %2604 = vmatprep.subr.bf16.mxu0 %v2966_v2  ;;  %v845_v9 = vadd.f32 %v2367_v55, %v844_v8  ;;  %v2388_v19 = vld [vmem:[%s3488_s6 + $0x1] ss:$0 sm:$0xff] }
 0x103   : > { %v856_v30 = vpack.c.bf16 %v774_v29, %v771_v28  ;;  %v921_v10 = vpack.c.bf16 %v845_v9, %v842_v6 }
 0x105   : > { %v863_v33 = vsel %vm858_vm3, %v856_v30, 0  ;;  %2605 = vmatpush3.bf16.msra.mxu0 %v921_v10 }
 0x106   : > { %2610 = vmatprep.subr.bf16.mxu0 %v2966_v2 }
 0x108   : > { %2597 = vmatpush3.bf16.xpose.msra.mxu1 %v863_v33 }
 0x109   : > { %2618 = vmatprep.subr.bf16.mxu1 %v2836_v54 }
 0x10f   : > { %2599 = vmatmul.mubr.msk.bf16.vlgmr.msra.gmra.mxu1 %vm858_vm3, %v855_v34 }
 0x110   : > { %2622 = vmatprep.mubr.msk.bf16.mxu1 %vm654_vm2, %v3165_v13  ;;  %2619 = vmatpush3.bf16.msra.mxu1 %v2836_v54 }
 0x111   : > { %2620 = vmatprep.subr.bf16.mxu1 %v2837_v1 }
 0x114   : > { %2621 = vmatpush3.bf16.msra.mxu1 %v2837_v1 }
 0x115   : > { %2634 = vmatprep.subr.bf16.mxu1 %v2966_v2 }
 0x117   : > { %2623 = vmatmul.mubr.msk.bf16.vlgmr.msra.gmra.mxu1 %vm654_vm2, %v3171_v14 }
 0x118   : > { %2638 = vmatprep.mubr.msk.bf16.mxu1 %vm2967_vm0, %v2966_v2 }
 0x1cf   : > { %v902_v48 = vpop.f32.mrf.mxu1 }
 0x1d0   : > { %v903_v49 = vadd.f32 %v902_v48, %v3202_v47  ;;  %v2841_v48 = vld [vmem:[%s3489_s7 + $0x10] sm:$0xff]  }
 0x1d1   : > { %v2600_v50 = vpop.f32.mrf.mxu1 }
 0x1d2   : > { %v909_v51 = vsel %vm908_vm11, %v903_v49, -inf }
 0x1d3   : > { %910 = vmax.xlane.f32.xlu0 %v909_v51  ;;  %v905_v52 = vpop.f32.mrf.mxu1 }
 0x1d5   : > { %v2601_v53 = vpop.f32.mrf.mxu1 }
 0x1d7   : > { %v2624_v20 = vpop.f32.mrf.mxu1 }
 0x1d8   : > { %v1106_v21 = vadd.f32 %v2624_v20, %v2388_v19  ;;  %v2405_v20 = vld [vmem:[%s3491_s9 + $0x4] sm:$0xf] }
 0x1d9   : > { %v1097_v22 = vpop.f32.mrf.mxu1 }
 0x1da   : > { %v1186_v23 = vpack.c.bf16 %v1106_v21, %v1106_v21  ;;  %v1098_v26 = vadd.f32 %v2388_v19, %v1097_v22 }
 0x1db   : > { %v2625_v24 = vpop.f32.mrf.mxu1 }
 0x1dc   : > { %v1194_v25 = vsel %vm858_vm3, %v1186_v23, 0  ;;  %v1303_v23 = vsel %vm926_vm12, %v2405_v20, 0 }
 0x1dd   : > { %2635 = vmatpush3.bf16.xpose.msra.mxu1 %v1194_v25  ;;  %v1100_v27 = vpop.f32.mrf.mxu1  ;;  %v2422_v25 = vld [vmem:[%s3488_s6 + $0x2] ss:$0 sm:$0xff] }
 0x1de   : > { %v1101_v28 = vadd.f32 %v2388_v19, %v1100_v27  ;;  %2636 = vmatprep.subr.bf16.mxu1 %v2966_v2 }
 0x1e0   : > { %v1185_v29 = vpack.c.bf16 %v1101_v28, %v1098_v26 }
 0x1e2   : > { %v1191_v30 = vsel %vm858_vm3, %v1185_v29, 0 }
 0x1e5   : > { %2637 = vmatpush3.bf16.xpose.msra.mxu1 %v1191_v30 }
 0x1e6   : > { %2656 = vmatprep.subr.bf16.mxu1 %v2966_v2 }
 0x25c   : > { %v911_v60 = vpop.xlane.xlu0 %910 }
 0x25d   : > { %v912_v61 = vsub.f32 %v903_v49, %v911_v60 }
 0x25f   : > { %v913_v62 = vmul.f32 1.442695, %v912_v61 }
 0x261   : > { %2854 = vpow2.f32 %v913_v62 }
 0x26e   : > { %v2855_v63 = vpop.eup %2854 }
 0x26f   : > { %v915_v0 = vsel %vm908_vm11, %v2855_v63, 0.0 }
 0x270   : > { %916 = vadd.xlane.f32.xlu0 %v915_v0 }
 0x2f9   : > { %v917_v11 = vpop.xlane.xlu0 %916 }
 0x2fa   : > { %2856 = vrcp.f32 %v917_v11 }
 0x307   : > { %v2857_v12 = vpop.eup %2856 }
 0x308   : > { %v919_v15 = vmul.f32 %v2857_v12, %v2855_v63 }
 0x30a   : > { %v920_v17 = vpack.c.bf16 %v919_v15, %v919_v15 }
 0x30c   : > { %2607 = vmatmul.mubr.msk.bf16.vlgmr.msra.gmra.mxu0 %vm908_vm11, %v920_v17  ;;  %v2843_v17 = vld [vmem:[%s3487_s5 + $0x20] sm:$0xff]  }
 0x30d   : > { %2611 = vmatpush3.bf16.msra.mxu0 %v2838_v16  ;;  %2614 = vmatprep.mubr.msk.bf16.mxu0 %vm2967_vm0, %v2966_v2  ;;  %v2842_v16 = vld [vmem:[%s3487_s5 + $0x28] sm:$0xff]  }
 0x30e   : > { %2612 = vmatprep.subr.bf16.mxu0 %v2966_v2 }
 0x311   : > { %2613 = vmatpush3.bf16.msra.mxu0 %v2839_v18 }
 0x312   : > { %2626 = vmatprep.subr.bf16.mxu0 %v2840_v46 }
 0x314   : > { %2615 = vmatmul.mubr.msk.bf16.vlgmr.msra.gmra.mxu0 %vm654_vm2, %v3154_v7 }
 0x315   : > { %2630 = vmatprep.mubr.msk.bf16.mxu0 %vm654_vm2, %v3165_v13  ;;  %2627 = vmatpush3.bf16.msra.mxu0 %v2840_v46 }
 0x316   : > { %2628 = vmatprep.subr.bf16.mxu0 %v2841_v48 }
 0x319   : > { %2629 = vmatpush3.bf16.msra.mxu0 %v2841_v48  ;;  %v2413_v48 = vld [vmem:[%s3486_s4 + $0x2] ss:$0 sm:$0xff] }
 0x31a   : > { %2642 = vmatprep.subr.bf16.mxu0 %v2966_v2 }
 0x31c   : > { %2631 = vmatmul.mubr.msk.bf16.vlgmr.msra.gmra.mxu0 %vm654_vm2, %v3171_v14 }
 0x31d   : > { %2646 = vmatprep.mubr.msk.bf16.mxu0 %vm2967_vm0, %v2966_v2 }
 0x3cc   : > { %v964_v31 = vpop.f32.mrf.mxu0 }
 0x3cd   : > { %v970_v45 = vpack.c.bf16 %v964_v31, %v964_v31 }
 0x3ce   : > { %v2608_v32 = vpop.f32.mrf.mxu0 }
 0x3d0   : > { %v967_v33 = vpop.f32.mrf.mxu0 }
 0x3d2   : > { %v2609_v34 = vpop.f32.mrf.mxu0 }
 0x3d4   : > { %v1031_v36 = vpop.f32.mrf.mxu0 }
 0x3d5   : > { %v1032_v37 = vadd.f32 %v2379_v35, %v1031_v36  ;;  %v2844_v36 = vld [vmem:[%s3485_s3 + $0x28] sm:$0xff]  }
 0x3d6   : > { %v2616_v38 = vpop.f32.mrf.mxu0 }
 0x3d7   : > { %v1037_v40 = vmul.f32 0.35355338, %v1032_v37 }
 0x3d8   : > { %v1034_v41 = vpop.f32.mrf.mxu0 }
 0x3d9   : > { %v1184_v42 = vpack.c.bf16 %v1037_v40, %v1037_v40  ;;  %v2845_v40 = vld [vmem:[%s3485_s3 + $0x20] sm:$0xff]  }
 0x3da   : > { %v2617_v44 = vpop.f32.mrf.mxu0 }
 0x3db   : > { %2639 = vmatmul.mubr.msk.bf16.vlgmr.msra.gmra.mxu1 %vm858_vm3, %v1184_v42 }
 0x3dc   : > { %2657 = vmatpush3.bf16.msra.mxu1 %v1349_v43  ;;  %2658 = vmatprep.mubr.msk.bf16.mxu1 %vm2967_vm0, %v2966_v2  ;;  %v2632_v60 = vpop.f32.mrf.mxu0 }
 0x3dd   : > { %v1179_v61 = vadd.f32 %v2632_v60, %v2398_v59  ;;  %2670 = vmatprep.subr.bf16.mxu1 %v2842_v16 }
 0x3de   : > { %v1170_v8 = vpop.f32.mrf.mxu0 }
 0x3df   : > { %v1249_v62 = vpack.c.bf16 %v1179_v61, %v1179_v61  ;;  %v1171_v10 = vadd.f32 %v2398_v59, %v1170_v8 }
 0x3e0   : > { %v2633_v9 = vpop.f32.mrf.mxu0 }
 0x3e1   : > { %v1254_v63 = vsel %vm926_vm12, %v1249_v62, 0 }
 0x3e2   : > { %2643 = vmatpush3.bf16.msra.mxu0 %v1254_v63  ;;  %v1173_v11 = vpop.f32.mrf.mxu0 }
 0x3e3   : > { %2659 = vmatmul.mubr.msk.bf16.vlgmr.msra.gmra.mxu1 %vm858_vm3, %v970_v45  ;;  %2644 = vmatprep.subr.bf16.mxu0 %v2966_v2  ;;  %v1174_v12 = vadd.f32 %v2398_v59, %v1173_v11 }
 0x3e4   : > { %2674 = vmatprep.mubr.msk.bf16.mxu1 %vm654_vm2, %v3165_v13  ;;  %2671 = vmatpush3.bf16.msra.mxu1 %v2842_v16 }
 0x3e5   : > { %v1248_v15 = vpack.c.bf16 %v1174_v12, %v1171_v10  ;;  %2672 = vmatprep.subr.bf16.mxu1 %v2843_v17 }
 0x3e7   : > { %2645 = vmatpush3.bf16.msra.mxu0 %v1248_v15 }
 0x3e8   : > { %2650 = vmatprep.subr.bf16.mxu0 %v2966_v2  ;;  %2673 = vmatpush3.bf16.msra.mxu1 %v2843_v17 }
 0x3e9   : > { %2686 = vmatprep.subr.bf16.mxu1 %v2966_v2 }
 0x3eb   : > { %2675 = vmatmul.mubr.msk.bf16.vlgmr.msra.gmra.mxu1 %vm654_vm2, %v3171_v14 }
 0x3ec   : > { %2690 = vmatprep.mubr.msk.bf16.mxu1 %vm2967_vm0, %v2966_v2 }
 0x49b   : > { %v1230_v49 = vpop.f32.mrf.mxu1 }
 0x49c   : > { %v1231_v50 = vadd.f32 %v1230_v49, %v3202_v47 }
 0x49d   : > { %v2640_v51 = vpop.f32.mrf.mxu1 }
 0x49e   : > { %v1236_v52 = vsel %vm908_vm11, %v1231_v50, -inf }
 0x49f   : > { %1237 = vmax.xlane.f32.xlu1 %v1236_v52  ;;  %v1233_v53 = vpop.f32.mrf.mxu1 }
 0x4a1   : > { %v2641_v54 = vpop.f32.mrf.mxu1 }
 0x4a3   : > { %v3271_v55 = vpop.f32.mrf.mxu1 }
 0x4a5   : > { %v2660_v56 = vpop.f32.mrf.mxu1 }
 0x4a7   : > { %v1388_v57 = vpop.f32.mrf.mxu1 }
 0x4a8   : > { %v2846_v57 = vld [vmem:[%s3489_s7 + $0x28] sm:$0xff]  }
 0x4a9   : > { %v2661_v58 = vpop.f32.mrf.mxu1 }
 0x4aa   : > { %v2847_v58 = vld [vmem:[%s3489_s7 + $0x20] sm:$0xff]  }
 0x4ab   : > { %v2676_v24 = vpop.f32.mrf.mxu1 }
 0x4ac   : > { %v1525_v26 = vadd.f32 %v2676_v24, %v2422_v25  ;;  %v2439_v24 = vld [vmem:[%s3491_s9 + $0x8] sm:$0xf] }
 0x4ad   : > { %v1516_v27 = vpop.f32.mrf.mxu1 }
 0x4ae   : > { %v1605_v28 = vpack.c.bf16 %v1525_v26, %v1525_v26  ;;  %v1517_v29 = vadd.f32 %v2422_v25, %v1516_v27  ;;  %v1722_v27 = vsel %vm926_vm12, %v2439_v24, 0 }
 0x4af   : > { %v2677_v30 = vpop.f32.mrf.mxu1 }
 0x4b0   : > { %v1613_v31 = vsel %vm858_vm3, %v1605_v28, 0  ;;  %v2848_v28 = vld [vmem:[%s3487_s5 + $0x38] sm:$0xff]   ;;  %v2851_v30 = vld [vmem:[%s3485_s3 + $0x30] sm:$0xff]  }
 0x4b1   : > { %2687 = vmatpush3.bf16.xpose.msra.mxu1 %v1613_v31  ;;  %v1519_v32 = vpop.f32.mrf.mxu1 }
 0x4b2   : > { %v1520_v33 = vadd.f32 %v2422_v25, %v1519_v32  ;;  %2688 = vmatprep.subr.bf16.mxu1 %v2966_v2 }
 0x4b4   : > { %v1604_v34 = vpack.c.bf16 %v1520_v33, %v1517_v29  ;;  %v2850_v29 = vld [vmem:[%s3485_s3 + $0x38] sm:$0xff]   ;;  %v2849_v33 = vld [vmem:[%s3487_s5 + $0x30] sm:$0xff]  }
 0x4b6   : > { %v1610_v42 = vsel %vm858_vm3, %v1604_v34, 0 }
 0x4b9   : > { %2689 = vmatpush3.bf16.xpose.msra.mxu1 %v1610_v42 }
 0x4ba   : > { %2708 = vmatprep.subr.bf16.mxu1 %v2966_v2 }
 0x528   : > { %v1238_v0 = vpop.xlane.xlu1 %1237 }
 0x529   : > { %v1239_v1 = vsub.f32 %v1231_v50, %v1238_v0 }
 0x52b   : > { %v1240_v3 = vmul.f32 1.442695, %v1239_v1  ;;  %v2432_v1 = vld [vmem:[%s3490_s8 + $0x2] ss:$0 sm:$0xff] }
 0x52d   : > { %2858 = vpow2.f32 %v1240_v3 }
 0x53a   : > { %v2859_v4 = vpop.eup %2858 }
 0x53b   : > { %v1242_v6 = vsel %vm908_vm11, %v2859_v4, 0.0 }
 0x53c   : > { %1243 = vadd.xlane.f32.xlu1 %v1242_v6 }
 0x5c5   : > { %v1244_v18 = vpop.xlane.xlu1 %1243 }
 0x5c6   : > { %2860 = vrcp.f32 %v1244_v18 }
 0x5d3   : > { %v2861_v19 = vpop.eup %2860 }
 0x5d4   : > { %v1246_v21 = vmul.f32 %v2861_v19, %v2859_v4 }
 0x5d6   : > { %v1247_v22 = vpack.c.bf16 %v1246_v21, %v1246_v21 }
 0x5d8   : > { %2647 = vmatmul.mubr.msk.bf16.vlgmr.msra.gmra.mxu0 %vm908_vm11, %v1247_v22 }
 0x5d9   : > { %2651 = vmatpush3.bf16.msra.mxu0 %v1303_v23  ;;  %2652 = vmatprep.mubr.msk.bf16.mxu0 %vm2967_vm0, %v2966_v2 }
 0x5da   : > { %2662 = vmatprep.subr.bf16.mxu0 %v2966_v2 }
 0x698   : > { %v1290_v35 = vpop.f32.mrf.mxu0 }
 0x699   : > { %v1296_v37 = vpack.c.bf16 %v1290_v35, %v1290_v35 }
 0x69a   : > { %v2648_v38 = vpop.f32.mrf.mxu0 }
 0x69b   : > { %2653 = vmatmul.mubr.msk.bf16.vlgmr.msra.gmra.mxu0 %vm858_vm3, %v1296_v37 }
 0x69c   : > { %2663 = vmatpush3.bf16.msra.mxu0 %v2844_v36  ;;  %v1293_v39 = vpop.f32.mrf.mxu0  ;;  %2666 = vmatprep.mubr.msk.bf16.mxu0 %vm2967_vm0, %v2966_v2 }
 0x69d   : > { %2664 = vmatprep.subr.bf16.mxu0 %v2966_v2 }
 0x69e   : > { %v2649_v41 = vpop.f32.mrf.mxu0 }
 0x6a0   : > { %2665 = vmatpush3.bf16.msra.mxu0 %v2845_v40 }
 0x6a1   : > { %2678 = vmatprep.subr.bf16.mxu0 %v2846_v57 }
 0x6a3   : > { %2667 = vmatmul.mubr.msk.bf16.vlgmr.msra.gmra.mxu0 %vm654_vm2, %v3154_v7 }
 0x6a4   : > { %2682 = vmatprep.mubr.msk.bf16.mxu0 %vm654_vm2, %v3165_v13  ;;  %2679 = vmatpush3.bf16.msra.mxu0 %v2846_v57 }
 0x6a5   : > { %2680 = vmatprep.subr.bf16.mxu0 %v2847_v58 }
 0x6a8   : > { %2681 = vmatpush3.bf16.msra.mxu0 %v2847_v58 }
 0x6a9   : > { %2694 = vmatprep.subr.bf16.mxu0 %v2966_v2 }
 0x6ab   : > { %2683 = vmatmul.mubr.msk.bf16.vlgmr.msra.gmra.mxu0 %vm654_vm2, %v3171_v14 }
 0x6ac   : > { %2698 = vmatprep.mubr.msk.bf16.mxu0 %vm2967_vm0, %v2966_v2 }
 0x75b   : > { %v3320_v43 = vpop.f32.mrf.mxu0 }
 0x75c   : > { %v1386_v40 = vadd.f32 %v3271_v55, %v3320_v43  ;;  %v2446_v55 = vld [vmem:[%s3486_s4 + $0x3] ss:$0 sm:$0xff] }
 0x75d   : > { %v2654_v44 = vpop.f32.mrf.mxu0 }
 0x75f   : > { %v1342_v45 = vpop.f32.mrf.mxu0 }
 0x761   : > { %v2655_v46 = vpop.f32.mrf.mxu0 }
 0x762   : > { %v2455_v46 = vld [vmem:[%s3488_s6 + $0x3] ss:$0 sm:$0xff] }
 0x763   : > { %v1450_v49 = vpop.f32.mrf.mxu0 }
 0x764   : > { %v1451_v50 = vadd.f32 %v2413_v48, %v1450_v49 }
 0x765   : > { %v2668_v51 = vpop.f32.mrf.mxu0 }
 0x766   : > { %v1456_v52 = vmul.f32 0.35355338, %v1451_v50 }
 0x767   : > { %v1453_v53 = vpop.f32.mrf.mxu0 }
 0x768   : > { %v1603_v54 = vpack.c.bf16 %v1456_v52, %v1456_v52 }
 0x769   : > { %v2669_v56 = vpop.f32.mrf.mxu0 }
 0x76a   : > { %2691 = vmatmul.mubr.msk.bf16.vlgmr.msra.gmra.mxu1 %vm858_vm3, %v1603_v54 }
 0x76b   : > { %2712 = vmatprep.mubr.msk.bf16.mxu1 %vm2967_vm0, %v2966_v2  ;;  %v2684_v3 = vpop.f32.mrf.mxu0  ;;  %2709 = vmatpush3.bf16.msra.mxu1 %v2850_v29 }
 0x76c   : > { %v1598_v4 = vadd.f32 %v2684_v3, %v2432_v1  ;;  %2710 = vmatprep.subr.bf16.mxu1 %v2966_v2 }
 0x76d   : > { %v1589_v16 = vpop.f32.mrf.mxu0 }
 0x76e   : > { %v1668_v6 = vpack.c.bf16 %v1598_v4, %v1598_v4  ;;  %v1590_v18 = vadd.f32 %v2432_v1, %v1589_v16 }
 0x76f   : > { %v2685_v17 = vpop.f32.mrf.mxu0  ;;  %2711 = vmatpush3.bf16.msra.mxu1 %v2851_v30 }
 0x770   : > { %v1673_v8 = vsel %vm926_vm12, %v1668_v6, 0 }
 0x771   : > { %2695 = vmatpush3.bf16.msra.mxu0 %v1673_v8  ;;  %v1592_v19 = vpop.f32.mrf.mxu0 }
 0x772   : > { %2696 = vmatprep.subr.bf16.mxu0 %v2966_v2  ;;  %v1593_v20 = vadd.f32 %v2432_v1, %v1592_v19  ;;  %2713 = vmatmul.mubr.msk.bf16.vlgmr.msra.gmra.mxu1 %vm654_vm2, %v3154_v7 }
 0x773   : > { %2728 = vmatprep.mubr.msk.bf16.mxu1 %vm654_vm2, %v3165_v13 }
 0x774   : > { %v1667_v21 = vpack.c.bf16 %v1593_v20, %v1590_v18 }
 0x776   : > { %2697 = vmatpush3.bf16.msra.mxu0 %v1667_v21 }
 0x777   : > { %2702 = vmatprep.subr.bf16.mxu0 %v2966_v2 }
 0x82a   : > { %v1649_v59 = vpop.f32.mrf.mxu1 }
 0x82b   : > { %v1650_v60 = vadd.f32 %v1649_v59, %v3202_v47 }
 0x82c   : > { %v2692_v61 = vpop.f32.mrf.mxu1 }
 0x82d   : > { %v1655_v62 = vsel %vm908_vm11, %v1650_v60, -inf }
 0x82e   : > { %1656 = vmax.xlane.f32.xlu0 %v1655_v62  ;;  %v1652_v63 = vpop.f32.mrf.mxu1  ;;  %v2852_v62 = vld [vmem:[%s3489_s7 + $0x38] sm:$0xff]  }
 0x82f   : > { %v2853_v63 = vld [vmem:[%s3489_s7 + $0x30] sm:$0xff]   ;;  %2724 = vmatprep.subr.bf16.mxu1 %v2852_v62 }
 0x830   : > { %v2693_v0 = vpop.f32.mrf.mxu1  ;;  %2725 = vmatpush3.bf16.msra.mxu1 %v2852_v62 }
 0x831   : > { %2726 = vmatprep.subr.bf16.mxu1 %v2853_v63 }
 0x832   : > { %v1824_v7 = vpop.f32.mrf.mxu1 }
 0x833   : > { %v1825_v58 = vadd.f32 %v2446_v55, %v1824_v7 }
 0x834   : > { %v2714_v37 = vpop.f32.mrf.mxu1  ;;  %2727 = vmatpush3.bf16.msra.mxu1 %v2853_v63 }
 0x835   : > { %v1830_v59 = vmul.f32 0.35355338, %v1825_v58  ;;  %2740 = vmatprep.subr.bf16.mxu1 %v2966_v2 }
 0x836   : > { %v1827_v38 = vpop.f32.mrf.mxu1 }
 0x837   : > { %v1977_v61 = vpack.c.bf16 %v1830_v59, %v1830_v59  ;;  %2729 = vmatmul.mubr.msk.bf16.vlgmr.msra.gmra.mxu1 %vm654_vm2, %v3171_v14  ;;  %v2474_v38 = vld [vmem:[%s3492_s10] ss:$0 sm:$0xff] }
 0x838   : > { %v2715_v39 = vpop.f32.mrf.mxu1  ;;  %2744 = vmatprep.mubr.msk.bf16.mxu1 %vm2967_vm0, %v2966_v2 }
 0x8b7   : > { %v1657_v9 = vpop.xlane.xlu0 %1656 }
 0x8b8   : > { %v1658_v10 = vsub.f32 %v1650_v60, %v1657_v9  ;;  %v2465_v9 = vld [vmem:[%s3490_s8 + $0x3] ss:$0 sm:$0xff] }
 0x8ba   : > { %v1659_v11 = vmul.f32 1.442695, %v1658_v10 }
 0x8bc   : > { %2862 = vpow2.f32 %v1659_v11 }
 0x8c9   : > { %v2863_v12 = vpop.eup %2862 }
 0x8ca   : > { %v1661_v15 = vsel %vm908_vm11, %v2863_v12, 0.0 }
 0x8cb   : > { %1662 = vadd.xlane.f32.xlu1 %v1661_v15 }
 0x8f7   : > { %v2730_v10 = vpop.f32.mrf.mxu1 }
 0x8f8   : > { %v1972_v11 = vadd.f32 %v2730_v10, %v2465_v9 }
 0x954   : > { %v1663_v22 = vpop.xlane.xlu1 %1662 }
 0x955   : > { %2864 = vrcp.f32 %v1663_v22 }
 0x962   : > { %v2865_v23 = vpop.eup %2864 }
 0x963   : > { %v1665_v25 = vmul.f32 %v2865_v23, %v2863_v12  ;;  %v1963_v12 = vpop.f32.mrf.mxu1 }
 0x964   : > { %v1964_v21 = vadd.f32 %v2465_v9, %v1963_v12 }
 0x965   : > { %v1666_v26 = vpack.c.bf16 %v1665_v25, %v1665_v25  ;;  %v2731_v15 = vpop.f32.mrf.mxu1 }
 0x967   : > { %2699 = vmatmul.mubr.msk.bf16.vlgmr.msra.gmra.mxu0 %vm908_vm11, %v1666_v26  ;;  %v1966_v22 = vpop.f32.mrf.mxu1 }
 0x968   : > { %2703 = vmatpush3.bf16.msra.mxu0 %v1722_v27  ;;  %2704 = vmatprep.mubr.msk.bf16.mxu0 %vm2967_vm0, %v2966_v2  ;;  %v1967_v23 = vadd.f32 %v2465_v9, %v1966_v22  ;;  %v2472_v27 = vld [vmem:[%s3491_s9 + $0xc] sm:$0xf] }
 0x969   : > { %2716 = vmatprep.subr.bf16.mxu0 %v2848_v28  ;;  %v2096_v30 = vsel %vm926_vm12, %v2472_v27, 0 }
 0x96a   : > { %v2041_v24 = vpack.c.bf16 %v1967_v23, %v1964_v21 }
 0xa27   : > { %v1709_v31 = vpop.f32.mrf.mxu0 }
 0xa28   : > { %v1715_v32 = vpack.c.bf16 %v1709_v31, %v1709_v31 }
 0xa29   : > { %v2700_v34 = vpop.f32.mrf.mxu0 }
 0xa2a   : > { %2705 = vmatmul.mubr.msk.bf16.vlgmr.msra.gmra.mxu0 %vm858_vm3, %v1715_v32 }
 0xa2b   : > { %2717 = vmatpush3.bf16.msra.mxu0 %v2848_v28  ;;  %v1712_v35 = vpop.f32.mrf.mxu0  ;;  %2720 = vmatprep.mubr.msk.bf16.mxu0 %vm654_vm2, %v3165_v13 }
 0xa2c   : > { %2718 = vmatprep.subr.bf16.mxu0 %v2849_v33 }
 0xa2d   : > { %v2701_v36 = vpop.f32.mrf.mxu0 }
 0xa2f   : > { %2719 = vmatpush3.bf16.msra.mxu0 %v2849_v33 }
 0xa30   : > { %2732 = vmatprep.subr.bf16.mxu0 %v2966_v2 }
 0xa32   : > { %2721 = vmatmul.mubr.msk.bf16.vlgmr.msra.gmra.mxu0 %vm654_vm2, %v3171_v14  ;;  %v2042_v14 = vpack.c.bf16 %v1972_v11, %v1972_v11 }
 0xa33   : > { %2736 = vmatprep.mubr.msk.bf16.mxu0 %vm2967_vm0, %v2966_v2 }
 0xa34   : > { %v2047_v16 = vsel %vm926_vm12, %v2042_v14, 0 }
 0xa35   : > { %2741 = vmatpush3.bf16.msra.mxu1 %v2047_v16 }
 0xa36   : > { %2742 = vmatprep.subr.bf16.mxu1 %v2966_v2 }
 0xa39   : > { %2743 = vmatpush3.bf16.msra.mxu1 %v2041_v24 }
 0xa3a   : > { %2748 = vmatprep.subr.bf16.mxu1 %v2966_v2 }
 0xaea   : > { %v1758_v41 = vpop.f32.mrf.mxu0 }
 0xaeb   : > { %v3382_v13 = vadd.f32 %v1758_v41, %v1386_v40 }
 0xaec   : > { %v2706_v42 = vpop.f32.mrf.mxu0 }
 0xaee   : > { %v1761_v44 = vpop.f32.mrf.mxu0 }
 0xaf0   : > { %v2707_v45 = vpop.f32.mrf.mxu0 }
 0xaf2   : > { %v2722_v48 = vpop.f32.mrf.mxu0 }
 0xaf3   : > { %v1899_v49 = vadd.f32 %v2722_v48, %v2455_v46 }
 0xaf4   : > { %v1890_v50 = vpop.f32.mrf.mxu0 }
 0xaf5   : > { %v1979_v51 = vpack.c.bf16 %v1899_v49, %v1899_v49  ;;  %v1891_v43 = vadd.f32 %v2455_v46, %v1890_v50 }
 0xaf6   : > { %v2723_v52 = vpop.f32.mrf.mxu0 }
 0xaf7   : > { %v1987_v53 = vsel %vm858_vm3, %v1979_v51, 0  ;;  %v2475_v52 = vld [vmem:[%s3493_s11] ss:$0 sm:$0xff] }
 0xaf8   : > { %v1893_v54 = vpop.f32.mrf.mxu0  ;;  %2733 = vmatpush3.bf16.xpose.msra.mxu0 %v1987_v53 }
 0xaf9   : > { %v1894_v56 = vadd.f32 %v2455_v46, %v1893_v54  ;;  %2734 = vmatprep.subr.bf16.mxu0 %v2966_v2  ;;  %v2476_v54 = vld [vmem:[%s3494_s12] ss:$0 sm:$0xff] }
 0xafb   : > { %v1978_v57 = vpack.c.bf16 %v1894_v56, %v1891_v43 }
 0xafd   : > { %v1984_v60 = vsel %vm858_vm3, %v1978_v57, 0 }
 0xb00   : > { %2735 = vmatpush3.bf16.xpose.msra.mxu0 %v1984_v60 }
 0xb07   : > { %2737 = vmatmul.mubr.msk.bf16.vlgmr.msra.gmra.mxu0 %vm858_vm3, %v1977_v61 }
 0xbc7   : > { %v2023_v0 = vpop.f32.mrf.mxu0 }
 0xbc8   : > { %v2024_v1 = vadd.f32 %v2023_v0, %v3202_v47 }
 0xbc9   : > { %v2738_v3 = vpop.f32.mrf.mxu0 }
 0xbca   : > { %v2029_v4 = vsel %vm908_vm11, %v2024_v1, -inf }
 0xbcb   : > { %2030 = vmax.xlane.f32.xlu0 %v2029_v4  ;;  %v2026_v6 = vpop.f32.mrf.mxu0 }
 0xbcd   : > { %v2739_v8 = vpop.f32.mrf.mxu0 }
 0xc54   : > { %v2031_v47 = vpop.xlane.xlu0 %2030 }
 0xc55   : > { %v2032_v17 = vsub.f32 %v2024_v1, %v2031_v47 }
 0xc57   : > { %v2033_v18 = vmul.f32 1.442695, %v2032_v17 }
 0xc59   : > { %2866 = vpow2.f32 %v2033_v18 }
 0xc66   : > { %v2867_v19 = vpop.eup %2866 }
 0xc67   : > { %v2035_v20 = vsel %vm908_vm11, %v2867_v19, 0.0 }
 0xc68   : > { %2036 = vadd.xlane.f32.xlu1 %v2035_v20 }
 0xcf1   : > { %v2037_v25 = vpop.xlane.xlu1 %2036 }
 0xcf2   : > { %2868 = vrcp.f32 %v2037_v25 }
 0xcff   : > { %v2869_v26 = vpop.eup %2868 }
 0xd00   : > { %v2039_v28 = vmul.f32 %v2869_v26, %v2867_v19 }
 0xd02   : > { %v2040_v29 = vpack.c.bf16 %v2039_v28, %v2039_v28 }
 0xd04   : > { %2745 = vmatmul.mubr.msk.bf16.vlgmr.msra.gmra.mxu1 %vm908_vm11, %v2040_v29 }
 0xd05   : > { %2749 = vmatpush3.bf16.msra.mxu1 %v2096_v30  ;;  %2750 = vmatprep.mubr.msk.bf16.mxu1 %vm2967_vm0, %v2966_v2 }
 0xdc4   : > { %v2083_v31 = vpop.f32.mrf.mxu1 }
 0xdc5   : > { %v2089_v32 = vpack.c.bf16 %v2083_v31, %v2083_v31 }
 0xdc6   : > { %v2746_v33 = vpop.f32.mrf.mxu1 }
 0xdc7   : > { %2751 = vmatmul.mubr.msk.bf16.vlgmr.msra.gmra.mxu1 %vm858_vm3, %v2089_v32 }
 0xdc8   : > { %v2086_v34 = vpop.f32.mrf.mxu1 }
 0xdca   : > { %v2747_v35 = vpop.f32.mrf.mxu1 }
 0xe87   : > { %v2132_v36 = vpop.f32.mrf.mxu1 }
 0xe88   : > { %v2138_v7 = vadd.f32 %v2132_v36, %v3382_v13 }
 0xe89   : > { %v2752_v37 = vpop.f32.mrf.mxu1 }
 0xe8a   : > { %v2140_v39 = vadd.f32 %v2138_v7, %v3144_v5 }
 0xe8b   : > { %v2135_v40 = vpop.f32.mrf.mxu1 }
 0xe8c   : > { %v2148_v2 = vadd.f32 %v2474_v38, %v2140_v39 }
 0xe8d   : > { %v2753_v41 = vpop.f32.mrf.mxu1 }
 0xe8e   : > { %v2149_v42 = vsel %vm654_vm2, %v2148_v2, 0.0 }
 0xe8f   : > { %2150 = vadd.xlane.f32.xlu0 %v2149_v42 }
 0xf18   : > { %v2151_v44 = vpop.xlane.xlu0 %2150 }
 0xf19   : > { %v2153_v45 = vmul.f32 0.03125, %v2151_v44 }
 0xf1b   : > { %v2154_v46 = vsub.f32 %v2148_v2, %v2153_v45 }
 0xf1d   : > { %v2155_v13 = vmul.f32 %v2154_v46, %v2154_v46 }
 0xf1f   : > { %v2156_v48 = vsel %vm654_vm2, %v2155_v13, 0.0 }
 0xf20   : > { %2157 = vadd.xlane.f32.xlu1 %v2156_v48 }
 0xfa9   : > { %v2158_v49 = vpop.xlane.xlu1 %2157 }
 0xfaa   : > { %v2159_v50 = vmul.f32 0.03125, %v2158_v49 }
 0xfac   : > { %v2160_v51 = vadd.f32 1e-05, %v2159_v50 }
 0xfae   : > { %2870 = vrsqrt.f32 %v2160_v51 }
 0xfbb   : > { %v2871_v5 = vpop.eup %2870 }
 0xfbc   : > { %v2162_v53 = vmul.f32 %v2871_v5, %v2154_v46 }
 0xfbe   : > { %v2170_v55 = vmul.f32 %v2475_v52, %v2162_v53 }
 0xfc0   : > { %v2178_v43 = vadd.f32 %v2476_v54, %v2170_v55 }
 0xfc2   : > { %2179 = vst.msk [vmem:[%s551_s24] sm:$0xff] %vm654_vm2, %v2178_v43 }
 0xfc3   : > { %2885 = shalt.err (!%p2882_p0)
}
 0xfc4   : > { %s2886_s1 = scalar_lea.hbm %s2194_s28, 128  ;;  %s2890_s16 = scalar_lea.hbm %s3495_s13, 512 }
 0xfc5   : > { %p2887_p1 = scmp.ne.s32.totalorder %s2194_s28, %s2886_s1  ;;  %p2891_p5 = scmp.lt.s32.totalorder %s2194_s28, %s3495_s13 }
 0xfc6   : > { %p2892_p6 = scmp.lt.s32.totalorder %s2890_s16, %s2886_s1 }
 0xfc7   : > { %p2888_p2 = pnand %p2887_p1, %p3091_p3 }
 0xfc8   : > { %p2893_p7 = por %p2892_p6, %p2891_p5 }
 0xfc9   : > { %p2889_p4 = pneg %p2888_p2 }
 0xfcb   : > { %p2894_p9 = pnand %p2893_p7, %p2889_p4 }
 0xfcd   : > { %2897 = shalt.err (!%p2894_p9)
}
 0xfce   : > { %2754 = dma.vmem_to_hbm [thread:$0]  (%p3091_p3), %s2197_s23, 128, %s2194_s28, %s2181_s29  }
 0xfcf PF: > { %s3515_s24 = sld [smem:[#allocation6_spill]]  ;;  %p2760_p10 = scmp.ge.s32.totalorder %s2964_s15, 2 }
 0xfd1   : > { %p2757_p11 = pnand %p2760_p10, %p3100_p8 }
 0xfd3   : > { %p2758_p12 = pneg %p2757_p11 }
 0xfd5   : > { %s2208_s25 = sand.u32 1, %s3515_s24  }
 0xfd6   : > { %s2209_s30 = scalar_lea.sflag [#allocation4], %s2208_s25 }
 0xfd7   : > { %2931 = dma.done.wait (%p2758_p12), %s2209_s30, 128  }
 0xfd8   : > { %2933 = vsyncadd (%p2758_p12), %s2209_s30, 4294967168  ;;  %s26_s15 = sadd.s32 1, %s2964_s15   ;;  %s3517_s18 = sld [smem:[#allocation12_spill]] }
 0xfd9   : > { %p23_p13 = scmp.ge.s32.totalorder %s26_s15, 6   ;;  %s3518_s28 = sld [smem:[#allocation7_spill]] }
 0xfda   : > { %s3519_s29 = sld [smem:[#allocation8_spill]]  ;;  %s3522_s25 = smov %s2940_s26 }
 0xfdb   : > { %s3520_s30 = sld [smem:[#allocation9_spill]]  ;;  %s3523_s26 = smov %s2944_s27 }
 0xfdc   : > { %s3521_s14 = sld [smem:[#allocation10_spill]]  ;;  %25 = sbr.rel (!%p23_p13) target bundleno = 8 (0x8), region = 134 }
 0xfde   : > { %s3524_s27 = smov %s3517_s18 }
 0xfe1   :  { %2214 = vsyncpa [#allocation4], 1 }
 0xfe2   :  { %2216 = vsyncpa [#allocation4 + $0x1], 1 }

</bundles_post_ra>
